<compile_context>
chip_gen: v6e
topology: v6e:2x2x1
jax: 0.10.0
libtpu: 0.0.40
codegen_flags: <defaults>
</compile_context>

<pallas_src>
import functools
import math

import jax
import jax.numpy as jnp
from jax.experimental import pallas as pl
from jax.experimental.pallas import tpu as pltpu


# ---------------------------------------------------------------------------
# In-kernel math helpers.
# ---------------------------------------------------------------------------
def _layer_norm(x, eps=1e-6):
    mu = jnp.mean(x, axis=-1, keepdims=True)
    xc = x - mu
    var = jnp.mean(xc * xc, axis=-1, keepdims=True)
    return xc * jax.lax.rsqrt(var + eps)


def _rms_norm(x, w, eps=1e-6):
    ms = jnp.mean(x * x, axis=-1, keepdims=True)
    return x * jax.lax.rsqrt(ms + eps) * w


def _gelu_tanh(x):
    c = math.sqrt(2.0 / math.pi)
    return 0.5 * x * (1.0 + jnp.tanh(c * (x + 0.044715 * x * x * x)))


def _vmem_limit(resident_bytes):
    # Derive the scoped-VMEM request from the tiling plan (double-buffered blocks +
    # scratch) with 2x headroom — never just "chip cap minus 25%".
    return int(min(100 << 20, max(32 << 20, 2 * int(resident_bytes))))


# ---------------------------------------------------------------------------
# Kernel A: norm1 + modulate + QKV projection + qk RMS-norm (per stream, per tile).
# Outputs q/k/v directly in (B, heads, L, D) layout (no transposes).
# ---------------------------------------------------------------------------
def _qkv_kernel(x_ref, sh_ref, sc_ref, qkv_w_ref, qn_ref, kn_ref,
                q_ref, k_ref, v_ref, *, heads, head_dim, eps=1e-6):
    H = heads * head_dim
    x = x_ref[0].astype(jnp.float32)                              # (TS, H)
    xm = _layer_norm(x, eps) * (1.0 + sc_ref[0]) + sh_ref[0]      # (TS, H)
    qkv = jnp.dot(xm.astype(jnp.bfloat16), qkv_w_ref[...],
                  preferred_element_type=jnp.float32)             # (TS, 3H) f32
    scale = 1.0 / math.sqrt(head_dim)                             # folded into q
    qn = qn_ref[0]                                                # (D,)
    kn = kn_ref[0]
    for h in range(heads):                                        # static per-head lane slices
        lo = h * head_dim
        qh = qkv[:, lo:lo + head_dim]
        kh = qkv[:, H + lo:H + lo + head_dim]
        vh = qkv[:, 2 * H + lo:2 * H + lo + head_dim]
        q_ref[0, h] = (_rms_norm(qh, qn, eps) * scale).astype(q_ref.dtype)
        k_ref[0, h] = _rms_norm(kh, kn, eps).astype(k_ref.dtype)
        v_ref[0, h] = vh.astype(v_ref.dtype)


def _qkv_call(x, shift1, scale1, params, *, heads, seq_tile):
    B, Lx, H = x.shape
    D = H // heads
    TS = seq_tile
    assert Lx % TS == 0
    qkv_w = params["qkv_w"].astype(jnp.bfloat16)
    qn_w = params["qn_w"].astype(jnp.float32)
    kn_w = params["kn_w"].astype(jnp.float32)

    resident = (2 * TS * H * 2                 # x tile (bf16, double buffered)
                + 2 * 2 * H * 4                # shift / scale
                + 2 * H * 3 * H * 2            # qkv_w (bf16)
                + 2 * 2 * D * 4                # q/k norm scales
                + 2 * 3 * heads * TS * D * 2)  # q/k/v output tiles (bf16)

    out_sds = jax.ShapeDtypeStruct((B, heads, Lx, D), jnp.bfloat16)
    qkv_out_spec = pl.BlockSpec((1, heads, TS, D), lambda b, i: (b, 0, i, 0))
    kernel = functools.partial(_qkv_kernel, heads=heads, head_dim=D)
    return pl.pallas_call(
        kernel,
        out_shape=(out_sds, out_sds, out_sds),
        grid_spec=pltpu.PrefetchScalarGridSpec(
            num_scalar_prefetch=0,
            grid=(B, Lx // TS),
            in_specs=[
                pl.BlockSpec((1, TS, H), lambda b, i: (b, i, 0)),
                pl.BlockSpec((1, 1, H), lambda b, i: (b, 0, 0)),
                pl.BlockSpec((1, 1, H), lambda b, i: (b, 0, 0)),
                # TODO(synk): stream / single-buffer at production H.
                pl.BlockSpec((H, 3 * H), lambda b, i: (0, 0)),
                pl.BlockSpec((1, D), lambda b, i: (0, 0)),
                pl.BlockSpec((1, D), lambda b, i: (0, 0)),
            ],
            out_specs=(qkv_out_spec, qkv_out_spec, qkv_out_spec),
        ),
        compiler_params=pltpu.CompilerParams(
            dimension_semantics=("parallel", "parallel"),
            vmem_limit_bytes=_vmem_limit(resident),
        ),
    )(x, shift1, scale1, qkv_w, qn_w, kn_w)


# ---------------------------------------------------------------------------
# Kernel B: flash attention over the joint [img ; txt] sequence (online softmax).
# ---------------------------------------------------------------------------
def _flash_kernel(q_ref, k_ref, v_ref, o_ref, m_sc, l_sc, acc_sc):
    kv = pl.program_id(2)

    @pl.when(kv == 0)
    def _():
        m_sc[...] = jnp.full(m_sc.shape, -jnp.inf, m_sc.dtype)
        l_sc[...] = jnp.zeros(l_sc.shape, l_sc.dtype)
        acc_sc[...] = jnp.zeros(acc_sc.shape, acc_sc.dtype)

    q = q_ref[0]                                        # (heads, TQ, D) bf16, scale folded in
    k = k_ref[0]                                        # (heads, TKV, D)
    v = v_ref[0]

    s = jnp.einsum("hqd,hkd->hqk", q, k, preferred_element_type=jnp.float32)
    m_prev = m_sc[...]
    m_new = jnp.maximum(m_prev, jnp.max(s, axis=-1, keepdims=True))
    alpha = jnp.exp(m_prev - m_new)
    p = jnp.exp(s - m_new)
    l_sc[...] = alpha * l_sc[...] + jnp.sum(p, axis=-1, keepdims=True)
    acc_sc[...] = alpha * acc_sc[...] + jnp.einsum(
        "hqk,hkd->hqd", p.astype(v.dtype), v, preferred_element_type=jnp.float32)
    m_sc[...] = m_new

    @pl.when(kv == pl.num_programs(2) - 1)
    def _():
        # Exact denominator (review correctness note about approx reciprocal at large L).
        o_ref[0] = (acc_sc[...] / l_sc[...]).astype(o_ref.dtype)


def _flash_call(q, k, v, *, q_tile, kv_tile):
    B, NH, L, D = q.shape
    TQ, TKV = q_tile, kv_tile
    assert L % TQ == 0 and L % TKV == 0
    resident = (2 * NH * TQ * D * 2                      # q tile
                + 2 * 2 * NH * TKV * D * 2               # k, v tiles
                + 2 * NH * TQ * D * 2                    # out tile
                + NH * TQ * (2 + D) * 4)                 # m/l/acc scratch
    return pl.pallas_call(
        _flash_kernel,
        out_shape=jax.ShapeDtypeStruct((B, NH, L, D), jnp.bfloat16),
        grid_spec=pltpu.PrefetchScalarGridSpec(
            num_scalar_prefetch=0,
            grid=(B, L // TQ, L // TKV),
            in_specs=[
                pl.BlockSpec((1, NH, TQ, D), lambda b, i, j: (b, 0, i, 0)),
                pl.BlockSpec((1, NH, TKV, D), lambda b, i, j: (b, 0, j, 0)),
                pl.BlockSpec((1, NH, TKV, D), lambda b, i, j: (b, 0, j, 0)),
            ],
            out_specs=pl.BlockSpec((1, NH, TQ, D), lambda b, i, j: (b, 0, i, 0)),
            scratch_shapes=[
                pltpu.VMEM((NH, TQ, 1), jnp.float32),
                pltpu.VMEM((NH, TQ, 1), jnp.float32),
                pltpu.VMEM((NH, TQ, D), jnp.float32),
            ],
        ),
        compiler_params=pltpu.CompilerParams(
            dimension_semantics=("parallel", "parallel", "arbitrary"),
            vmem_limit_bytes=_vmem_limit(resident),
        ),
    )(q, k, v)


# ---------------------------------------------------------------------------
# Kernel C: attention output projection + gated residual + norm2/modulate + MLP
# + gated residual (per stream, per tile).
# ---------------------------------------------------------------------------
def _post_kernel(x_ref, attn_ref, g1_ref, sh2_ref, sc2_ref, g2_ref,
                 pw_ref, fc1w_ref, fc1b_ref, fc2w_ref, fc2b_ref, out_ref,
                 *, heads, eps=1e-6):
    x = x_ref[0].astype(jnp.float32)                             # (TS, H)

    # Output projection with proj_w pre-reshaped to (heads, D, H): per-head bf16 MXU
    # dots accumulated in f32 — no (heads, L, D) -> (L, H) relayout anywhere.
    proj = jnp.dot(attn_ref[0, 0], pw_ref[0], preferred_element_type=jnp.float32)
    for h in range(1, heads):
        proj = proj + jnp.dot(attn_ref[0, h], pw_ref[h],
                              preferred_element_type=jnp.float32)
    x = x + g1_ref[0] * proj                                     # gated residual #1

    hmid = _layer_norm(x, eps) * (1.0 + sc2_ref[0]) + sh2_ref[0]
    hmid = jnp.dot(hmid.astype(jnp.bfloat16), fc1w_ref[...],
                   preferred_element_type=jnp.float32) + fc1b_ref[...]
    # TODO(synk): on v5e, interleave the f32 tanh with the fc2 matmul over N tiles
    # (single f32 EUP); on v6e/v7x the gelu could run on the bf16 EUP path.
    hmid = _gelu_tanh(hmid)
    hmid = jnp.dot(hmid.astype(jnp.bfloat16), fc2w_ref[...],
                   preferred_element_type=jnp.float32) + fc2b_ref[...]
    out_ref[0] = (x + g2_ref[0] * hmid).astype(out_ref.dtype)    # gated residual #2


def _post_call(x, attn, gate1, shift2, scale2, gate2, params, *,
               heads, seq_tile, block_offset, out_dtype):
    B, Lx, H = x.shape
    D = H // heads
    MH = params["fc1_w"].shape[1]
    TS = seq_tile
    assert Lx % TS == 0
    proj_w3 = params["proj_w"].astype(jnp.bfloat16).reshape(heads, D, H)
    fc1_w = params["fc1_w"].astype(jnp.bfloat16)
    fc2_w = params["fc2_w"].astype(jnp.bfloat16)
    fc1_b = params["fc1_b"].astype(jnp.float32)
    fc2_b = params["fc2_b"].astype(jnp.float32)

    resident = (2 * TS * H * 2 + 2 * heads * TS * D * 2          # x + attn tiles
                + 2 * 4 * H * 4                                  # mod vectors
                + 2 * (heads * D * H + H * MH + MH * H) * 2      # proj/fc1/fc2 weights (bf16)
                + 2 * (MH + H) * 4                               # biases
                + 2 * TS * H * jnp.dtype(out_dtype).itemsize)    # output tile

    kernel = functools.partial(_post_kernel, heads=heads)
    mod_spec = pl.BlockSpec((1, 1, H), lambda b, i: (b, 0, 0))
    return pl.pallas_call(
        kernel,
        out_shape=jax.ShapeDtypeStruct((B, Lx, H), out_dtype),
        grid_spec=pltpu.PrefetchScalarGridSpec(
            num_scalar_prefetch=0,
            grid=(B, Lx // TS),
            in_specs=[
                pl.BlockSpec((1, TS, H), lambda b, i: (b, i, 0)),
                pl.BlockSpec((1, heads, TS, D),
                             lambda b, i, off=block_offset: (b, 0, i + off, 0)),
                mod_spec, mod_spec, mod_spec, mod_spec,
                # TODO(synk): stream / single-buffer these at production H.
                pl.BlockSpec((heads, D, H), lambda b, i: (0, 0, 0)),
                pl.BlockSpec((H, MH), lambda b, i: (0, 0)),
                pl.BlockSpec((1, MH), lambda b, i: (0, 0)),
                pl.BlockSpec((MH, H), lambda b, i: (0, 0)),
                pl.BlockSpec((1, H), lambda b, i: (0, 0)),
            ],
            out_specs=pl.BlockSpec((1, TS, H), lambda b, i: (b, i, 0)),
        ),
        compiler_params=pltpu.CompilerParams(
            dimension_semantics=("parallel", "parallel"),
            vmem_limit_bytes=_vmem_limit(resident),
        ),
    )(x, attn, gate1, shift2, scale2, gate2, proj_w3, fc1_w, fc1_b, fc2_w, fc2_b)


# ---------------------------------------------------------------------------
# Wrapper: hoisted modulation, per-stream QKV, joint flash attention, per-stream post.
# ---------------------------------------------------------------------------
def mm_double_stream_block(img, txt, vec, img_params, txt_params, *, heads,
                           seq_tile=16, q_tile=16, kv_tile=16):
    B, Li, H = img.shape
    _, Lt, _ = txt.shape
    L = Li + Lt
    assert H % heads == 0
    assert Li % seq_tile == 0 and Lt % seq_tile == 0
    assert L % q_tile == 0 and L % kv_tile == 0
    # TODO(synk): at production shapes use seq/q/kv tiles of 256-512 and D=128 so MXU
    # contraction dims are 128/256-aligned; toy shapes here are below vreg granularity.

    # ---- hoisted modulation: Linear(SiLU(vec)) in f32 on the XLA side ----
    sv = vec.astype(jnp.float32)
    sv = sv * jax.nn.sigmoid(sv)

    def mod6(p):
        m = sv @ p["mod_w"].astype(jnp.float32) + p["mod_b"].astype(jnp.float32)
        return [c[:, None, :] for c in jnp.split(m, 6, axis=-1)]   # 6 x (B, 1, H)

    i_sh1, i_sc1, i_g1, i_sh2, i_sc2, i_g2 = mod6(img_params)
    t_sh1, t_sc1, t_g1, t_sh2, t_sc2, t_g2 = mod6(txt_params)

    # ---- bf16 activations end-to-end ----
    img_bf = img.astype(jnp.bfloat16)
    txt_bf = txt.astype(jnp.bfloat16)

    # ---- per-stream QKV (q/k/v in (B, heads, L, D), q pre-scaled by 1/sqrt(D)) ----
    iq, ik, iv = _qkv_call(img_bf, i_sh1, i_sc1, img_params, heads=heads, seq_tile=seq_tile)
    tq, tk, tv = _qkv_call(txt_bf, t_sh1, t_sc1, txt_params, heads=heads, seq_tile=seq_tile)

    # Joint sequence; XLA-side concat (TODO(synk): could be removed entirely by aliasing
    # the img/txt qkv outputs into one buffer or iterating KV tiles over both sources).
    q = jnp.concatenate([iq, tq], axis=2)
    k = jnp.concatenate([ik, tk], axis=2)
    v = jnp.concatenate([iv, tv], axis=2)

    attn = _flash_call(q, k, v, q_tile=q_tile, kv_tile=kv_tile)    # (B, heads, L, D) bf16

    # ---- per-stream projection + residual + MLP ----
    img_out = _post_call(img_bf, attn, i_g1, i_sh2, i_sc2, i_g2, img_params,
                         heads=heads, seq_tile=seq_tile, block_offset=0,
                         out_dtype=img.dtype)
    txt_out = _post_call(txt_bf, attn, t_g1, t_sh2, t_sc2, t_g2, txt_params,
                         heads=heads, seq_tile=seq_tile, block_offset=Li // seq_tile,
                         out_dtype=txt.dtype)
    return img_out, txt_out


# ---------------------------------------------------------------------------
# Pure-JAX reference (same bf16 quantization choices) to validate.
# ---------------------------------------------------------------------------
def _ref_forward(img, txt, vec, ip, tp, *, heads):
    B, Li, H = img.shape
    Lt = txt.shape[1]
    D = H // heads
    f32, bf16 = jnp.float32, jnp.bfloat16

    def bdot(a, w):
        return jnp.dot(a.astype(bf16), w.astype(bf16), preferred_element_type=f32)

    def ln(x, eps=1e-6):
        mu = jnp.mean(x, -1, keepdims=True)
        var = jnp.mean((x - mu) ** 2, -1, keepdims=True)
        return (x - mu) * jax.lax.rsqrt(var + eps)

    def rms(x, w, eps=1e-6):
        return x * jax.lax.rsqrt(jnp.mean(x * x, -1, keepdims=True) + eps) * w

    img = img.astype(bf16).astype(f32)
    txt = txt.astype(bf16).astype(f32)
    sv = vec.astype(f32)
    sv = sv * jax.nn.sigmoid(sv)

    def mod6(p):
        m = sv @ p["mod_w"].astype(f32) + p["mod_b"].astype(f32)
        return [c[:, None, :] for c in jnp.split(m, 6, axis=-1)]

    i_sh1, i_sc1, i_g1, i_sh2, i_sc2, i_g2 = mod6(ip)
    t_sh1, t_sc1, t_g1, t_sh2, t_sc2, t_g2 = mod6(tp)

    def qkv(x, sh, sc, p, L):
        xm = ln(x) * (1 + sc) + sh
        q, k, v = jnp.split(bdot(xm, p["qkv_w"]), 3, axis=-1)
        q = rms(q.reshape(B, L, heads, D), p["qn_w"][0]) / math.sqrt(D)
        k = rms(k.reshape(B, L, heads, D), p["kn_w"][0])
        v = v.reshape(B, L, heads, D)
        return q.astype(bf16), k.astype(bf16), v.astype(bf16)

    iq, ik, iv = qkv(img, i_sh1, i_sc1, ip, Li)
    tq, tk, tv = qkv(txt, t_sh1, t_sc1, tp, Lt)
    q = jnp.concatenate([iq, tq], 1)
    k = jnp.concatenate([ik, tk], 1)
    v = jnp.concatenate([iv, tv], 1)

    s = jnp.einsum("blhd,bmhd->bhlm", q, k, preferred_element_type=f32)
    p_ = jax.nn.softmax(s, axis=-1)
    o = jnp.einsum("bhlm,bmhd->blhd", p_.astype(bf16), v, preferred_element_type=f32)
    o = o.astype(bf16).astype(f32).reshape(B, Li + Lt, H)
    img_attn, txt_attn = o[:, :Li], o[:, Li:]

    def branch(x, a, g1, sh2, sc2, g2, p):
        x = x + g1 * bdot(a, p["proj_w"])
        h = ln(x) * (1 + sc2) + sh2
        h = bdot(h, p["fc1_w"]) + p["fc1_b"].astype(f32)
        c = math.sqrt(2.0 / math.pi)
        h = 0.5 * h * (1.0 + jnp.tanh(c * (h + 0.044715 * h ** 3)))
        h = bdot(h, p["fc2_w"]) + p["fc2_b"].astype(f32)
        return x + g2 * h

    return (branch(img, img_attn, i_g1, i_sh2, i_sc2, i_g2, ip),
            branch(txt, txt_attn, t_g1, t_sh2, t_sc2, t_g2, tp))


# ---------------------------------------------------------------------------
# Deterministic parameter init (shapes follow the PyTorch __init__).
# ---------------------------------------------------------------------------
def make_params(key, hidden, heads, mlp_hidden):
    D = hidden // heads
    ks = jax.random.split(key, 10)

    def nrm(k, shape, scale=0.05):
        return scale * jax.random.normal(k, shape, dtype=jnp.float32)

    return {
        "mod_w":  nrm(ks[0], (hidden, 6 * hidden)),
        "mod_b":  nrm(ks[1], (1, 6 * hidden), 0.02),
        "qkv_w":  nrm(ks[2], (hidden, 3 * hidden)),
        "qn_w":   1.0 + nrm(ks[3], (1, D), 0.1),
        "kn_w":   1.0 + nrm(ks[4], (1, D), 0.1),
        "proj_w": nrm(ks[5], (hidden, hidden)),
        "fc1_w":  nrm(ks[6], (hidden, mlp_hidden)),
        "fc1_b":  nrm(ks[7], (1, mlp_hidden), 0.02),
        "fc2_w":  nrm(ks[8], (mlp_hidden, hidden)),
        "fc2_b":  nrm(ks[9], (1, hidden), 0.02),
    }


if __name__ == "__main__":
    B, Li, Lt = 2, 32, 16
    heads, hidden = 4, 64
    mlp_hidden = int(hidden * 4.0)

    key = jax.random.PRNGKey(0)
    k_img, k_txt, k_vec, k_ip, k_tp = jax.random.split(key, 5)
    img = jax.random.normal(k_img, (B, Li, hidden), dtype=jnp.float32)
    txt = jax.random.normal(k_txt, (B, Lt, hidden), dtype=jnp.float32)
    vec = jax.random.normal(k_vec, (B, hidden), dtype=jnp.float32)

    img_params = make_params(k_ip, hidden, heads, mlp_hidden)
    txt_params = make_params(k_tp, hidden, heads, mlp_hidden)

    img_out, txt_out = mm_double_stream_block(
        img, txt, vec, img_params, txt_params,
        heads=heads, seq_tile=16, q_tile=16, kv_tile=16)
    jax.block_until_ready((img_out, txt_out))

    img_ref, txt_ref = _ref_forward(img, txt, vec, img_params, txt_params, heads=heads)
    # bf16 MXU matmuls + bf16 activations -> loose tolerance vs. the matching bf16 ref.
    assert jnp.allclose(img_out, img_ref, rtol=3e-2, atol=3e-2), "img mismatch"
    assert jnp.allclose(txt_out, txt_ref, rtol=3e-2, atol=3e-2), "txt mismatch"

    print("KERNEL_OK")
</pallas_src>

<mosaic_0001>
module attributes {stable_mosaic.version = 11 : i64} {
  func.func @_qkv_kernel(%arg0: i32, %arg1: i32, %arg2: memref<1x16x64xbf16, #tpu.memory_space<vmem>>, %arg3: memref<1x1x64xf32, #tpu.memory_space<vmem>>, %arg4: memref<1x1x64xf32, #tpu.memory_space<vmem>>, %arg5: memref<64x192xbf16, #tpu.memory_space<vmem>>, %arg6: memref<1x16xf32, #tpu.memory_space<vmem>>, %arg7: memref<1x16xf32, #tpu.memory_space<vmem>>, %arg8: memref<1x4x16x16xbf16, #tpu.memory_space<vmem>>, %arg9: memref<1x4x16x16xbf16, #tpu.memory_space<vmem>>, %arg10: memref<1x4x16x16xbf16, #tpu.memory_space<vmem>>) attributes {dimension_semantics = [#tpu.dimension_semantics<parallel>, #tpu.dimension_semantics<parallel>], iteration_bounds = array<i64: 2, 2>, scalar_prefetch = 0 : i64, scratch_operands = 0 : i64, tpu.core_type = #tpu.core_type<tc>, window_params = [{transform_indices = @transform_0, window_bounds = array<i64: 1, 16, 64>}, {transform_indices = @transform_1, window_bounds = array<i64: 1, 1, 64>}, {transform_indices = @transform_2, window_bounds = array<i64: 1, 1, 64>}, {pipeline_mode = #tpu.pipeline_mode<synchronous>, transform_indices = @transform_3, window_bounds = array<i64: 64, 192>}, {pipeline_mode = #tpu.pipeline_mode<synchronous>, transform_indices = @transform_4, window_bounds = array<i64: 1, 16>}, {pipeline_mode = #tpu.pipeline_mode<synchronous>, transform_indices = @transform_5, window_bounds = array<i64: 1, 16>}, {transform_indices = @transform_6, window_bounds = array<i64: 1, 4, 16, 16>}, {transform_indices = @transform_7, window_bounds = array<i64: 1, 4, 16, 16>}, {transform_indices = @transform_8, window_bounds = array<i64: 1, 4, 16, 16>}]} {
    %c0 = arith.constant 0 : index
    %c0_0 = arith.constant 0 : index
    %c0_1 = arith.constant 0 : index
    %0 = vector.load %arg2[%c0, %c0_0, %c0_1] : memref<1x16x64xbf16, #tpu.memory_space<vmem>>, vector<1x16x64xbf16>
    %1 = vector.shape_cast %0 : vector<1x16x64xbf16> to vector<16x64xbf16>
    %2 = arith.extf %1 : vector<16x64xbf16> to vector<16x64xf32>
    %cst = arith.constant dense<0.000000e+00> : vector<16xf32>
    %3 = vector.multi_reduction <add>, %2, %cst [1] : vector<16x64xf32> to vector<16xf32>
    %4 = vector.shape_cast %3 : vector<16xf32> to vector<16x1xf32>
    %cst_2 = arith.constant 6.400000e+01 : f32
    %5 = vector.broadcast %cst_2 : f32 to vector<16x1xf32>
    %6 = arith.divf %4, %5 : vector<16x1xf32>
    %7 = vector.broadcast %6 : vector<16x1xf32> to vector<16x64xf32>
    %8 = arith.subf %2, %7 : vector<16x64xf32>
    %9 = arith.mulf %8, %8 : vector<16x64xf32>
    %cst_3 = arith.constant dense<0.000000e+00> : vector<16xf32>
    %10 = vector.multi_reduction <add>, %9, %cst_3 [1] : vector<16x64xf32> to vector<16xf32>
    %11 = vector.shape_cast %10 : vector<16xf32> to vector<16x1xf32>
    %cst_4 = arith.constant 6.400000e+01 : f32
    %12 = vector.broadcast %cst_4 : f32 to vector<16x1xf32>
    %13 = arith.divf %11, %12 : vector<16x1xf32>
    %cst_5 = arith.constant 9.99999997E-7 : f32
    %14 = vector.broadcast %cst_5 : f32 to vector<16x1xf32>
    %15 = arith.addf %13, %14 : vector<16x1xf32>
    %16 = math.rsqrt %15 : vector<16x1xf32>
    %17 = vector.broadcast %16 : vector<16x1xf32> to vector<16x64xf32>
    %18 = arith.mulf %8, %17 : vector<16x64xf32>
    %c0_6 = arith.constant 0 : index
    %c0_7 = arith.constant 0 : index
    %c0_8 = arith.constant 0 : index
    %19 = vector.load %arg4[%c0_6, %c0_7, %c0_8] : memref<1x1x64xf32, #tpu.memory_space<vmem>>, vector<1x1x64xf32>
    %20 = vector.shape_cast %19 : vector<1x1x64xf32> to vector<1x64xf32>
    %cst_9 = arith.constant 1.000000e+00 : f32
    %21 = vector.broadcast %cst_9 : f32 to vector<1x64xf32>
    %22 = arith.addf %21, %20 : vector<1x64xf32>
    %23 = vector.broadcast %22 : vector<1x64xf32> to vector<16x64xf32>
    %24 = arith.mulf %18, %23 : vector<16x64xf32>
    %c0_10 = arith.constant 0 : index
    %c0_11 = arith.constant 0 : index
    %c0_12 = arith.constant 0 : index
    %25 = vector.load %arg3[%c0_10, %c0_11, %c0_12] : memref<1x1x64xf32, #tpu.memory_space<vmem>>, vector<1x1x64xf32>
    %26 = vector.shape_cast %25 : vector<1x1x64xf32> to vector<1x64xf32>
    %27 = vector.broadcast %26 : vector<1x64xf32> to vector<16x64xf32>
    %28 = arith.addf %24, %27 : vector<16x64xf32>
    %29 = arith.truncf %28 : vector<16x64xf32> to vector<16x64xbf16>
    %c0_13 = arith.constant 0 : index
    %c0_14 = arith.constant 0 : index
    %30 = vector.load %arg5[%c0_13, %c0_14] : memref<64x192xbf16, #tpu.memory_space<vmem>>, vector<64x192xbf16>
    %cst_15 = arith.constant dense<0.000000e+00> : vector<16x192xf32>
    %31 = tpu.matmul %29, %30, %cst_15 {dimension_numbers = #tpu.dot_dimension_numbers<[1], [0], [0], [1], [0, 0, 1, 1], [], []>} : vector<16x64xbf16>, vector<64x192xbf16>, vector<16x192xf32> -> vector<16x192xf32>
    %c0_16 = arith.constant 0 : index
    %c0_17 = arith.constant 0 : index
    %32 = vector.load %arg6[%c0_16, %c0_17] : memref<1x16xf32, #tpu.memory_space<vmem>>, vector<1x16xf32>
    %33 = vector.shape_cast %32 : vector<1x16xf32> to vector<16xf32>
    %c0_18 = arith.constant 0 : index
    %c0_19 = arith.constant 0 : index
    %34 = vector.load %arg7[%c0_18, %c0_19] : memref<1x16xf32, #tpu.memory_space<vmem>>, vector<1x16xf32>
    %35 = vector.shape_cast %34 : vector<1x16xf32> to vector<16xf32>
    %36 = vector.extract_strided_slice %31 {offsets = [0, 0], sizes = [16, 16], strides = [1, 1]} : vector<16x192xf32> to vector<16x16xf32>
    %37 = vector.extract_strided_slice %31 {offsets = [0, 64], sizes = [16, 16], strides = [1, 1]} : vector<16x192xf32> to vector<16x16xf32>
    %38 = vector.extract_strided_slice %31 {offsets = [0, 128], sizes = [16, 16], strides = [1, 1]} : vector<16x192xf32> to vector<16x16xf32>
    %39 = arith.mulf %36, %36 : vector<16x16xf32>
    %cst_20 = arith.constant dense<0.000000e+00> : vector<16xf32>
    %40 = vector.multi_reduction <add>, %39, %cst_20 [1] : vector<16x16xf32> to vector<16xf32>
    %41 = vector.shape_cast %40 : vector<16xf32> to vector<16x1xf32>
    %cst_21 = arith.constant 1.600000e+01 : f32
    %42 = vector.broadcast %cst_21 : f32 to vector<16x1xf32>
    %43 = arith.divf %41, %42 : vector<16x1xf32>
    %cst_22 = arith.constant 9.99999997E-7 : f32
    %44 = vector.broadcast %cst_22 : f32 to vector<16x1xf32>
    %45 = arith.addf %43, %44 : vector<16x1xf32>
    %46 = math.rsqrt %45 : vector<16x1xf32>
    %47 = vector.broadcast %46 : vector<16x1xf32> to vector<16x16xf32>
    %48 = arith.mulf %36, %47 : vector<16x16xf32>
    %49 = vector.shape_cast %33 : vector<16xf32> to vector<1x16xf32>
    %50 = vector.broadcast %49 : vector<1x16xf32> to vector<16x16xf32>
    %51 = arith.mulf %48, %50 : vector<16x16xf32>
    %cst_23 = arith.constant 2.500000e-01 : f32
    %52 = vector.broadcast %cst_23 : f32 to vector<16x16xf32>
    %53 = arith.mulf %51, %52 : vector<16x16xf32>
    %54 = arith.truncf %53 : vector<16x16xf32> to vector<16x16xbf16>
    %c0_24 = arith.constant 0 : index
    %c0_25 = arith.constant 0 : index
    %c0_26 = arith.constant 0 : index
    %c0_27 = arith.constant 0 : index
    %55 = vector.load %arg8[%c0_24, %c0_25, %c0_26, %c0_27] : memref<1x4x16x16xbf16, #tpu.memory_space<vmem>>, vector<1x1x16x16xbf16>
    %56 = vector.shape_cast %55 : vector<1x1x16x16xbf16> to vector<16x16xbf16>
    %57 = vector.shape_cast %54 : vector<16x16xbf16> to vector<1x1x16x16xbf16>
    tpu.vector_store %arg8[%c0_24, %c0_25, %c0_26, %c0_27], %57 {strides = array<i32>} : memref<1x4x16x16xbf16, #tpu.memory_space<vmem>>, vector<1x1x16x16xbf16>,
    %58 = arith.mulf %37, %37 : vector<16x16xf32>
    %cst_28 = arith.constant dense<0.000000e+00> : vector<16xf32>
    %59 = vector.multi_reduction <add>, %58, %cst_28 [1] : vector<16x16xf32> to vector<16xf32>
    %60 = vector.shape_cast %59 : vector<16xf32> to vector<16x1xf32>
    %cst_29 = arith.constant 1.600000e+01 : f32
    %61 = vector.broadcast %cst_29 : f32 to vector<16x1xf32>
    %62 = arith.divf %60, %61 : vector<16x1xf32>
    %cst_30 = arith.constant 9.99999997E-7 : f32
    %63 = vector.broadcast %cst_30 : f32 to vector<16x1xf32>
    %64 = arith.addf %62, %63 : vector<16x1xf32>
    %65 = math.rsqrt %64 : vector<16x1xf32>
    %66 = vector.broadcast %65 : vector<16x1xf32> to vector<16x16xf32>
    %67 = arith.mulf %37, %66 : vector<16x16xf32>
    %68 = vector.shape_cast %35 : vector<16xf32> to vector<1x16xf32>
    %69 = vector.broadcast %68 : vector<1x16xf32> to vector<16x16xf32>
    %70 = arith.mulf %67, %69 : vector<16x16xf32>
    %71 = arith.truncf %70 : vector<16x16xf32> to vector<16x16xbf16>
    %c0_31 = arith.constant 0 : index
    %c0_32 = arith.constant 0 : index
    %c0_33 = arith.constant 0 : index
    %c0_34 = arith.constant 0 : index
    %72 = vector.load %arg9[%c0_31, %c0_32, %c0_33, %c0_34] : memref<1x4x16x16xbf16, #tpu.memory_space<vmem>>, vector<1x1x16x16xbf16>
    %73 = vector.shape_cast %72 : vector<1x1x16x16xbf16> to vector<16x16xbf16>
    %74 = vector.shape_cast %71 : vector<16x16xbf16> to vector<1x1x16x16xbf16>
    tpu.vector_store %arg9[%c0_31, %c0_32, %c0_33, %c0_34], %74 {strides = array<i32>} : memref<1x4x16x16xbf16, #tpu.memory_space<vmem>>, vector<1x1x16x16xbf16>,
    %75 = arith.truncf %38 : vector<16x16xf32> to vector<16x16xbf16>
    %c0_35 = arith.constant 0 : index
    %c0_36 = arith.constant 0 : index
    %c0_37 = arith.constant 0 : index
    %c0_38 = arith.constant 0 : index
    %76 = vector.load %arg10[%c0_35, %c0_36, %c0_37, %c0_38] : memref<1x4x16x16xbf16, #tpu.memory_space<vmem>>, vector<1x1x16x16xbf16>
    %77 = vector.shape_cast %76 : vector<1x1x16x16xbf16> to vector<16x16xbf16>
    %78 = vector.shape_cast %75 : vector<16x16xbf16> to vector<1x1x16x16xbf16>
    tpu.vector_store %arg10[%c0_35, %c0_36, %c0_37, %c0_38], %78 {strides = array<i32>} : memref<1x4x16x16xbf16, #tpu.memory_space<vmem>>, vector<1x1x16x16xbf16>,
    %79 = vector.extract_strided_slice %31 {offsets = [0, 16], sizes = [16, 16], strides = [1, 1]} : vector<16x192xf32> to vector<16x16xf32>
    %80 = vector.extract_strided_slice %31 {offsets = [0, 80], sizes = [16, 16], strides = [1, 1]} : vector<16x192xf32> to vector<16x16xf32>
    %81 = vector.extract_strided_slice %31 {offsets = [0, 144], sizes = [16, 16], strides = [1, 1]} : vector<16x192xf32> to vector<16x16xf32>
    %82 = arith.mulf %79, %79 : vector<16x16xf32>
    %cst_39 = arith.constant dense<0.000000e+00> : vector<16xf32>
    %83 = vector.multi_reduction <add>, %82, %cst_39 [1] : vector<16x16xf32> to vector<16xf32>
    %84 = vector.shape_cast %83 : vector<16xf32> to vector<16x1xf32>
    %cst_40 = arith.constant 1.600000e+01 : f32
    %85 = vector.broadcast %cst_40 : f32 to vector<16x1xf32>
    %86 = arith.divf %84, %85 : vector<16x1xf32>
    %cst_41 = arith.constant 9.99999997E-7 : f32
    %87 = vector.broadcast %cst_41 : f32 to vector<16x1xf32>
    %88 = arith.addf %86, %87 : vector<16x1xf32>
    %89 = math.rsqrt %88 : vector<16x1xf32>
    %90 = vector.broadcast %89 : vector<16x1xf32> to vector<16x16xf32>
    %91 = arith.mulf %79, %90 : vector<16x16xf32>
    %92 = vector.shape_cast %33 : vector<16xf32> to vector<1x16xf32>
    %93 = vector.broadcast %92 : vector<1x16xf32> to vector<16x16xf32>
    %94 = arith.mulf %91, %93 : vector<16x16xf32>
    %cst_42 = arith.constant 2.500000e-01 : f32
    %95 = vector.broadcast %cst_42 : f32 to vector<16x16xf32>
    %96 = arith.mulf %94, %95 : vector<16x16xf32>
    %97 = arith.truncf %96 : vector<16x16xf32> to vector<16x16xbf16>
    %c0_43 = arith.constant 0 : index
    %c1 = arith.constant 1 : index
    %c0_44 = arith.constant 0 : index
    %c0_45 = arith.constant 0 : index
    %98 = vector.load %arg8[%c0_43, %c1, %c0_44, %c0_45] : memref<1x4x16x16xbf16, #tpu.memory_space<vmem>>, vector<1x1x16x16xbf16>
    %99 = vector.shape_cast %98 : vector<1x1x16x16xbf16> to vector<16x16xbf16>
    %100 = vector.shape_cast %97 : vector<16x16xbf16> to vector<1x1x16x16xbf16>
    tpu.vector_store %arg8[%c0_43, %c1, %c0_44, %c0_45], %100 {strides = array<i32>} : memref<1x4x16x16xbf16, #tpu.memory_space<vmem>>, vector<1x1x16x16xbf16>,
    %101 = arith.mulf %80, %80 : vector<16x16xf32>
    %cst_46 = arith.constant dense<0.000000e+00> : vector<16xf32>
    %102 = vector.multi_reduction <add>, %101, %cst_46 [1] : vector<16x16xf32> to vector<16xf32>
    %103 = vector.shape_cast %102 : vector<16xf32> to vector<16x1xf32>
    %cst_47 = arith.constant 1.600000e+01 : f32
    %104 = vector.broadcast %cst_47 : f32 to vector<16x1xf32>
    %105 = arith.divf %103, %104 : vector<16x1xf32>
    %cst_48 = arith.constant 9.99999997E-7 : f32
    %106 = vector.broadcast %cst_48 : f32 to vector<16x1xf32>
    %107 = arith.addf %105, %106 : vector<16x1xf32>
    %108 = math.rsqrt %107 : vector<16x1xf32>
    %109 = vector.broadcast %108 : vector<16x1xf32> to vector<16x16xf32>
    %110 = arith.mulf %80, %109 : vector<16x16xf32>
    %111 = vector.shape_cast %35 : vector<16xf32> to vector<1x16xf32>
    %112 = vector.broadcast %111 : vector<1x16xf32> to vector<16x16xf32>
    %113 = arith.mulf %110, %112 : vector<16x16xf32>
    %114 = arith.truncf %113 : vector<16x16xf32> to vector<16x16xbf16>
    %c0_49 = arith.constant 0 : index
    %c1_50 = arith.constant 1 : index
    %c0_51 = arith.constant 0 : index
    %c0_52 = arith.constant 0 : index
    %115 = vector.load %arg9[%c0_49, %c1_50, %c0_51, %c0_52] : memref<1x4x16x16xbf16, #tpu.memory_space<vmem>>, vector<1x1x16x16xbf16>
    %116 = vector.shape_cast %115 : vector<1x1x16x16xbf16> to vector<16x16xbf16>
    %117 = vector.shape_cast %114 : vector<16x16xbf16> to vector<1x1x16x16xbf16>
    tpu.vector_store %arg9[%c0_49, %c1_50, %c0_51, %c0_52], %117 {strides = array<i32>} : memref<1x4x16x16xbf16, #tpu.memory_space<vmem>>, vector<1x1x16x16xbf16>,
    %118 = arith.truncf %81 : vector<16x16xf32> to vector<16x16xbf16>
    %c0_53 = arith.constant 0 : index
    %c1_54 = arith.constant 1 : index
    %c0_55 = arith.constant 0 : index
    %c0_56 = arith.constant 0 : index
    %119 = vector.load %arg10[%c0_53, %c1_54, %c0_55, %c0_56] : memref<1x4x16x16xbf16, #tpu.memory_space<vmem>>, vector<1x1x16x16xbf16>
    %120 = vector.shape_cast %119 : vector<1x1x16x16xbf16> to vector<16x16xbf16>
    %121 = vector.shape_cast %118 : vector<16x16xbf16> to vector<1x1x16x16xbf16>
    tpu.vector_store %arg10[%c0_53, %c1_54, %c0_55, %c0_56], %121 {strides = array<i32>} : memref<1x4x16x16xbf16, #tpu.memory_space<vmem>>, vector<1x1x16x16xbf16>,
    %122 = vector.extract_strided_slice %31 {offsets = [0, 32], sizes = [16, 16], strides = [1, 1]} : vector<16x192xf32> to vector<16x16xf32>
    %123 = vector.extract_strided_slice %31 {offsets = [0, 96], sizes = [16, 16], strides = [1, 1]} : vector<16x192xf32> to vector<16x16xf32>
    %124 = vector.extract_strided_slice %31 {offsets = [0, 160], sizes = [16, 16], strides = [1, 1]} : vector<16x192xf32> to vector<16x16xf32>
    %125 = arith.mulf %122, %122 : vector<16x16xf32>
    %cst_57 = arith.constant dense<0.000000e+00> : vector<16xf32>
    %126 = vector.multi_reduction <add>, %125, %cst_57 [1] : vector<16x16xf32> to vector<16xf32>
    %127 = vector.shape_cast %126 : vector<16xf32> to vector<16x1xf32>
    %cst_58 = arith.constant 1.600000e+01 : f32
    %128 = vector.broadcast %cst_58 : f32 to vector<16x1xf32>
    %129 = arith.divf %127, %128 : vector<16x1xf32>
    %cst_59 = arith.constant 9.99999997E-7 : f32
    %130 = vector.broadcast %cst_59 : f32 to vector<16x1xf32>
    %131 = arith.addf %129, %130 : vector<16x1xf32>
    %132 = math.rsqrt %131 : vector<16x1xf32>
    %133 = vector.broadcast %132 : vector<16x1xf32> to vector<16x16xf32>
    %134 = arith.mulf %122, %133 : vector<16x16xf32>
    %135 = vector.shape_cast %33 : vector<16xf32> to vector<1x16xf32>
    %136 = vector.broadcast %135 : vector<1x16xf32> to vector<16x16xf32>
    %137 = arith.mulf %134, %136 : vector<16x16xf32>
    %cst_60 = arith.constant 2.500000e-01 : f32
    %138 = vector.broadcast %cst_60 : f32 to vector<16x16xf32>
    %139 = arith.mulf %137, %138 : vector<16x16xf32>
    %140 = arith.truncf %139 : vector<16x16xf32> to vector<16x16xbf16>
    %c0_61 = arith.constant 0 : index
    %c2 = arith.constant 2 : index
    %c0_62 = arith.constant 0 : index
    %c0_63 = arith.constant 0 : index
    %141 = vector.load %arg8[%c0_61, %c2, %c0_62, %c0_63] : memref<1x4x16x16xbf16, #tpu.memory_space<vmem>>, vector<1x1x16x16xbf16>
    %142 = vector.shape_cast %141 : vector<1x1x16x16xbf16> to vector<16x16xbf16>
    %143 = vector.shape_cast %140 : vector<16x16xbf16> to vector<1x1x16x16xbf16>
    tpu.vector_store %arg8[%c0_61, %c2, %c0_62, %c0_63], %143 {strides = array<i32>} : memref<1x4x16x16xbf16, #tpu.memory_space<vmem>>, vector<1x1x16x16xbf16>,
    %144 = arith.mulf %123, %123 : vector<16x16xf32>
    %cst_64 = arith.constant dense<0.000000e+00> : vector<16xf32>
    %145 = vector.multi_reduction <add>, %144, %cst_64 [1] : vector<16x16xf32> to vector<16xf32>
    %146 = vector.shape_cast %145 : vector<16xf32> to vector<16x1xf32>
    %cst_65 = arith.constant 1.600000e+01 : f32
    %147 = vector.broadcast %cst_65 : f32 to vector<16x1xf32>
    %148 = arith.divf %146, %147 : vector<16x1xf32>
    %cst_66 = arith.constant 9.99999997E-7 : f32
    %149 = vector.broadcast %cst_66 : f32 to vector<16x1xf32>
    %150 = arith.addf %148, %149 : vector<16x1xf32>
    %151 = math.rsqrt %150 : vector<16x1xf32>
    %152 = vector.broadcast %151 : vector<16x1xf32> to vector<16x16xf32>
    %153 = arith.mulf %123, %152 : vector<16x16xf32>
    %154 = vector.shape_cast %35 : vector<16xf32> to vector<1x16xf32>
    %155 = vector.broadcast %154 : vector<1x16xf32> to vector<16x16xf32>
    %156 = arith.mulf %153, %155 : vector<16x16xf32>
    %157 = arith.truncf %156 : vector<16x16xf32> to vector<16x16xbf16>
    %c0_67 = arith.constant 0 : index
    %c2_68 = arith.constant 2 : index
    %c0_69 = arith.constant 0 : index
    %c0_70 = arith.constant 0 : index
    %158 = vector.load %arg9[%c0_67, %c2_68, %c0_69, %c0_70] : memref<1x4x16x16xbf16, #tpu.memory_space<vmem>>, vector<1x1x16x16xbf16>
    %159 = vector.shape_cast %158 : vector<1x1x16x16xbf16> to vector<16x16xbf16>
    %160 = vector.shape_cast %157 : vector<16x16xbf16> to vector<1x1x16x16xbf16>
    tpu.vector_store %arg9[%c0_67, %c2_68, %c0_69, %c0_70], %160 {strides = array<i32>} : memref<1x4x16x16xbf16, #tpu.memory_space<vmem>>, vector<1x1x16x16xbf16>,
    %161 = arith.truncf %124 : vector<16x16xf32> to vector<16x16xbf16>
    %c0_71 = arith.constant 0 : index
    %c2_72 = arith.constant 2 : index
    %c0_73 = arith.constant 0 : index
    %c0_74 = arith.constant 0 : index
    %162 = vector.load %arg10[%c0_71, %c2_72, %c0_73, %c0_74] : memref<1x4x16x16xbf16, #tpu.memory_space<vmem>>, vector<1x1x16x16xbf16>
    %163 = vector.shape_cast %162 : vector<1x1x16x16xbf16> to vector<16x16xbf16>
    %164 = vector.shape_cast %161 : vector<16x16xbf16> to vector<1x1x16x16xbf16>
    tpu.vector_store %arg10[%c0_71, %c2_72, %c0_73, %c0_74], %164 {strides = array<i32>} : memref<1x4x16x16xbf16, #tpu.memory_space<vmem>>, vector<1x1x16x16xbf16>,
    %165 = vector.extract_strided_slice %31 {offsets = [0, 48], sizes = [16, 16], strides = [1, 1]} : vector<16x192xf32> to vector<16x16xf32>
    %166 = vector.extract_strided_slice %31 {offsets = [0, 112], sizes = [16, 16], strides = [1, 1]} : vector<16x192xf32> to vector<16x16xf32>
    %167 = vector.extract_strided_slice %31 {offsets = [0, 176], sizes = [16, 16], strides = [1, 1]} : vector<16x192xf32> to vector<16x16xf32>
    %168 = arith.mulf %165, %165 : vector<16x16xf32>
    %cst_75 = arith.constant dense<0.000000e+00> : vector<16xf32>
    %169 = vector.multi_reduction <add>, %168, %cst_75 [1] : vector<16x16xf32> to vector<16xf32>
    %170 = vector.shape_cast %169 : vector<16xf32> to vector<16x1xf32>
    %cst_76 = arith.constant 1.600000e+01 : f32
    %171 = vector.broadcast %cst_76 : f32 to vector<16x1xf32>
    %172 = arith.divf %170, %171 : vector<16x1xf32>
    %cst_77 = arith.constant 9.99999997E-7 : f32
    %173 = vector.broadcast %cst_77 : f32 to vector<16x1xf32>
    %174 = arith.addf %172, %173 : vector<16x1xf32>
    %175 = math.rsqrt %174 : vector<16x1xf32>
    %176 = vector.broadcast %175 : vector<16x1xf32> to vector<16x16xf32>
    %177 = arith.mulf %165, %176 : vector<16x16xf32>
    %178 = vector.shape_cast %33 : vector<16xf32> to vector<1x16xf32>
    %179 = vector.broadcast %178 : vector<1x16xf32> to vector<16x16xf32>
    %180 = arith.mulf %177, %179 : vector<16x16xf32>
    %cst_78 = arith.constant 2.500000e-01 : f32
    %181 = vector.broadcast %cst_78 : f32 to vector<16x16xf32>
    %182 = arith.mulf %180, %181 : vector<16x16xf32>
    %183 = arith.truncf %182 : vector<16x16xf32> to vector<16x16xbf16>
    %c0_79 = arith.constant 0 : index
    %c3 = arith.constant 3 : index
    %c0_80 = arith.constant 0 : index
    %c0_81 = arith.constant 0 : index
    %184 = vector.load %arg8[%c0_79, %c3, %c0_80, %c0_81] : memref<1x4x16x16xbf16, #tpu.memory_space<vmem>>, vector<1x1x16x16xbf16>
    %185 = vector.shape_cast %184 : vector<1x1x16x16xbf16> to vector<16x16xbf16>
    %186 = vector.shape_cast %183 : vector<16x16xbf16> to vector<1x1x16x16xbf16>
    tpu.vector_store %arg8[%c0_79, %c3, %c0_80, %c0_81], %186 {strides = array<i32>} : memref<1x4x16x16xbf16, #tpu.memory_space<vmem>>, vector<1x1x16x16xbf16>,
    %187 = arith.mulf %166, %166 : vector<16x16xf32>
    %cst_82 = arith.constant dense<0.000000e+00> : vector<16xf32>
    %188 = vector.multi_reduction <add>, %187, %cst_82 [1] : vector<16x16xf32> to vector<16xf32>
    %189 = vector.shape_cast %188 : vector<16xf32> to vector<16x1xf32>
    %cst_83 = arith.constant 1.600000e+01 : f32
    %190 = vector.broadcast %cst_83 : f32 to vector<16x1xf32>
    %191 = arith.divf %189, %190 : vector<16x1xf32>
    %cst_84 = arith.constant 9.99999997E-7 : f32
    %192 = vector.broadcast %cst_84 : f32 to vector<16x1xf32>
    %193 = arith.addf %191, %192 : vector<16x1xf32>
    %194 = math.rsqrt %193 : vector<16x1xf32>
    %195 = vector.broadcast %194 : vector<16x1xf32> to vector<16x16xf32>
    %196 = arith.mulf %166, %195 : vector<16x16xf32>
    %197 = vector.shape_cast %35 : vector<16xf32> to vector<1x16xf32>
    %198 = vector.broadcast %197 : vector<1x16xf32> to vector<16x16xf32>
    %199 = arith.mulf %196, %198 : vector<16x16xf32>
    %200 = arith.truncf %199 : vector<16x16xf32> to vector<16x16xbf16>
    %c0_85 = arith.constant 0 : index
    %c3_86 = arith.constant 3 : index
    %c0_87 = arith.constant 0 : index
    %c0_88 = arith.constant 0 : index
    %201 = vector.load %arg9[%c0_85, %c3_86, %c0_87, %c0_88] : memref<1x4x16x16xbf16, #tpu.memory_space<vmem>>, vector<1x1x16x16xbf16>
    %202 = vector.shape_cast %201 : vector<1x1x16x16xbf16> to vector<16x16xbf16>
    %203 = vector.shape_cast %200 : vector<16x16xbf16> to vector<1x1x16x16xbf16>
    tpu.vector_store %arg9[%c0_85, %c3_86, %c0_87, %c0_88], %203 {strides = array<i32>} : memref<1x4x16x16xbf16, #tpu.memory_space<vmem>>, vector<1x1x16x16xbf16>,
    %204 = arith.truncf %167 : vector<16x16xf32> to vector<16x16xbf16>
    %c0_89 = arith.constant 0 : index
    %c3_90 = arith.constant 3 : index
    %c0_91 = arith.constant 0 : index
    %c0_92 = arith.constant 0 : index
    %205 = vector.load %arg10[%c0_89, %c3_90, %c0_91, %c0_92] : memref<1x4x16x16xbf16, #tpu.memory_space<vmem>>, vector<1x1x16x16xbf16>
    %206 = vector.shape_cast %205 : vector<1x1x16x16xbf16> to vector<16x16xbf16>
    %207 = vector.shape_cast %204 : vector<16x16xbf16> to vector<1x1x16x16xbf16>
    tpu.vector_store %arg10[%c0_89, %c3_90, %c0_91, %c0_92], %207 {strides = array<i32>} : memref<1x4x16x16xbf16, #tpu.memory_space<vmem>>, vector<1x1x16x16xbf16>,
    return
  }
  func.func @transform_0(%arg0: i32, %arg1: i32) -> (i32, i32, i32) {
    %c0_i32 = arith.constant 0 : i32
    %c0_i32_0 = arith.constant 0 : i32
    return %arg0, %arg1, %c0_i32 : i32, i32, i32
  }
  func.func @transform_1(%arg0: i32, %arg1: i32) -> (i32, i32, i32) {
    %c0_i32 = arith.constant 0 : i32
    %c0_i32_0 = arith.constant 0 : i32
    %c0_i32_1 = arith.constant 0 : i32
    return %arg0, %c0_i32, %c0_i32_0 : i32, i32, i32
  }
  func.func @transform_2(%arg0: i32, %arg1: i32) -> (i32, i32, i32) {
    %c0_i32 = arith.constant 0 : i32
    %c0_i32_0 = arith.constant 0 : i32
    %c0_i32_1 = arith.constant 0 : i32
    return %arg0, %c0_i32, %c0_i32_0 : i32, i32, i32
  }
  func.func @transform_3(%arg0: i32, %arg1: i32) -> (i32, i32) {
    %c0_i32 = arith.constant 0 : i32
    %c0_i32_0 = arith.constant 0 : i32
    %c0_i32_1 = arith.constant 0 : i32
    return %c0_i32, %c0_i32_0 : i32, i32
  }
  func.func @transform_4(%arg0: i32, %arg1: i32) -> (i32, i32) {
    %c0_i32 = arith.constant 0 : i32
    %c0_i32_0 = arith.constant 0 : i32
    %c0_i32_1 = arith.constant 0 : i32
    return %c0_i32, %c0_i32_0 : i32, i32
  }
  func.func @transform_5(%arg0: i32, %arg1: i32) -> (i32, i32) {
    %c0_i32 = arith.constant 0 : i32
    %c0_i32_0 = arith.constant 0 : i32
    %c0_i32_1 = arith.constant 0 : i32
    return %c0_i32, %c0_i32_0 : i32, i32
  }
  func.func @transform_6(%arg0: i32, %arg1: i32) -> (i32, i32, i32, i32) {
    %c0_i32 = arith.constant 0 : i32
    %c0_i32_0 = arith.constant 0 : i32
    %c0_i32_1 = arith.constant 0 : i32
    return %arg0, %c0_i32, %arg1, %c0_i32_0 : i32, i32, i32, i32
  }
  func.func @transform_7(%arg0: i32, %arg1: i32) -> (i32, i32, i32, i32) {
    %c0_i32 = arith.constant 0 : i32
    %c0_i32_0 = arith.constant 0 : i32
    %c0_i32_1 = arith.constant 0 : i32
    return %arg0, %c0_i32, %arg1, %c0_i32_0 : i32, i32, i32, i32
  }
  func.func @transform_8(%arg0: i32, %arg1: i32) -> (i32, i32, i32, i32) {
    %c0_i32 = arith.constant 0 : i32
    %c0_i32_0 = arith.constant 0 : i32
    %c0_i32_1 = arith.constant 0 : i32
    return %arg0, %c0_i32, %arg1, %c0_i32_0 : i32, i32, i32, i32
  }
}

</mosaic_0001>

<bundles_post_ra>
// kernel: tpu_custom_call.1
= control target key start
LH: loop header
LB: loop body
LE: loop exit
PB: predicated region body
PF: predicated region fallthrough
CT: control target
= control target key end

     0   :  { %s2334_s0 = inlined_call_operand.hbm [shape: bf16[2,32,64], index: 0, kind: input, shape index: {}]   ;;  %s2335_s1 = inlined_call_operand.hbm [shape: f32[2,1,64], index: 1, kind: input, shape index: {}]   ;;  %s2336_s2 = inlined_call_operand.vmem [shape: f32[2,1,64], index: 2, kind: input, shape index: {}]   ;;  %s2337_s3 = inlined_call_operand.hbm [shape: bf16[64,192], index: 3, kind: input, shape index: {}]   ;;  %s2338_s4 = inlined_call_operand.vmem [shape: f32[1,16], index: 4, kind: input, shape index: {}]   ;;  %s2339_s5 = inlined_call_operand.vmem [shape: f32[1,16], index: 5, kind: input, shape index: {}]   ;;  %s2340_s6 = inlined_call_operand.vmem [shape: bf16[2,4,32,16], index: 6, kind: output, shape index: {0}]   ;;  %s2341_s7 = inlined_call_operand.vmem [shape: bf16[2,4,32,16], index: 7, kind: output, shape index: {1}]   ;;  %s2342_s8 = inlined_call_operand.vmem [shape: bf16[2,4,32,16], index: 8, kind: output, shape index: {2}]  }
   0x1   :  { %2348 = sst [smem:[#allocation17_spill]] %s2336_s2 }
   0x2   :  { %2349 = sst [smem:[#allocation18_spill]] %s2337_s3 }
   0x3   :  { %2350 = sst [smem:[#allocation19_spill]] %s2338_s4 }
   0x4   :  { %2351 = sst [smem:[#allocation20_spill]] %s2339_s5 }
   0x5   :  { %2352 = sst [smem:[#allocation21_spill]] %s2340_s6 }
   0x6   :  { %2353 = sst [smem:[#allocation22_spill]] %s2341_s7 }
   0x7   :  { %2354 = sst [smem:[#allocation23_spill]] %s2342_s8 }
   0x8   :  { %14 = vsyncpa [#allocation3], 0 }
   0x9   :  { %16 = vsyncpa [#allocation3 + $0x1], 0 }
   0xa   :  { %17 = vsyncpa [#allocation5], 0 }
   0xb   :  { %19 = vsyncpa [#allocation5 + $0x1], 0  ;;  %s1873_s27 = smov 0   ;;  %s1875_s28 = smov 0  }
   0xc   :  { %s1877_s29 = smov 0   ;;  %s1879_s30 = smov 0  }
   0xd   :  { %s1881_s9 = smov 0   ;;  %s1883_s10 = smov 0  }
   0xe   :  { %s1885_s11 = smov 0   ;;  %s1887_s12 = smov 0  }
   0xf   :  { %s1889_s13 = smov 0   ;;  %s1891_s14 = smov 0  }
  0x10   :  { %s1893_s15 = smov 0  }
  0x11 LB: > { %2355 = sst [smem:[#allocation13_spill]] %s1795_s11  ;;  %s1927_s16 = sadd.s32 4294967295, %s1811_s15   ;;  %s1811_s15 = sphi %s1893_s15, %s25_s15   ;;  %s1807_s14 = sphi %s1891_s14, %s2398_s14   ;;  %s1803_s13 = sphi %s1889_s13, %s2397_s13   ;;  %s1799_s12 = sphi %s1887_s12, %s2396_s12   ;;  %s1795_s11 = sphi %s1885_s11, %s2395_s11   ;;  %s1791_s10 = sphi %s1883_s10, %s2394_s10   ;;  %s1787_s9 = sphi %s1881_s9, %s2393_s9   ;;  %s1783_s30 = sphi %s1879_s30, %s2392_s30   ;;  %s1779_s29 = sphi %s1877_s29, %s2391_s29   ;;  %s1775_s28 = sphi %s1875_s28, %s2390_s28   ;;  %s1771_s27 = sphi %s1873_s27, %s2389_s27  }
  0x12   : > { %p59_p0 = scmp.ne.s32.totalorder %s1787_s9, %s1783_s30  ;;  %p2347_p1 = scmp.eq.s32.totalorder %s1927_s16, 0 }
  0x13   : > { %p1362_p3 = scmp.ge.s32.totalorder %s1811_s15, 1  ;;  %p269_p4 = scmp.lt.s32.totalorder %s1811_s15, 5 }
  0x14   : > { %p1936_p5 = por %p2347_p1, %p59_p0  ;;  %s1813_s19 = smov [#allocation6]  }
  0x15   : > { %p1940_p6 = pnand %p1362_p3, %p269_p4  ;;  %s281_s20 = sshll.u32 %s1813_s19, 4  ;;  %s282_s20 = int_to_ptr.vmem [resolvable:$true] %s281_s20 }
  0x16   : > { %s1642_s21 = scalar_lea.vmem %s282_s20, 1024  ;;  %p1650_p13 = scmp.lt.s32.totalorder %s282_s20, %s282_s20 }
  0x17   : > { %p1468_p7 = pneg %p1940_p6  ;;  %p1643_p10 = scmp.ne.s32.totalorder %s282_s20, %s1642_s21 }
  0x18   : > { %p1651_p0 = scmp.lt.s32.totalorder %s1642_s21, %s1642_s21 }
  0x19   : > { %p1469_p8 = pnand %p1468_p7, %p2347_p1 }
  0x1a   : > { %p1652_p2 = por %p1651_p0, %p1650_p13 }
  0x1b   : > { %p1633_p9 = pneg %p1469_p8 }
  0x1d   : > { %p1645_p11 = pnand %p1643_p10, %p1633_p9 }
  0x1f   : > { %p1646_p12 = pneg %p1645_p11 }
  0x21   : > { %p1653_p3 = pnand %p1652_p2, %p1646_p12 }
  0x23   : > { %1656 = shalt.err (!%p1653_p3)
}
  0x24   : > { %s1814_s22 = smov 128   ;;  %s1815_s23 = smov 8  }
  0x25   : > { %s2358_s3 = sld [smem:[#allocation18_spill]]  ;;  %s34_s26 = sadd.s32 1, %s1803_s13 }
  0x26   : > { %s37_s30 = sadd.s32 1, %s1807_s14  ;;  %p35_p2 = scmp.ge.s32.totalorder %s34_s26, 2 }
  0x27   : > { %s46_s19 = sadd.s32 1, %s1791_s10  ;;  %p53_p4 = scmp.ne.s32.totalorder %s1791_s10, %s1787_s9 }
  0x28   : > { %p54_p7 = scmp.eq.s32.totalorder %s1811_s15, 0  ;;  %s2400_s26 = smov (%p35_p2, %s34_s26), 0 }
  0x29   : > { %2359 = sst [smem:[#allocation14_spill]] %s2400_s26  ;;  %s2402_s30 = smov (!%p35_p2, %s37_s30), %s1807_s14 }
  0x2a   : > { %s42_s21 = ssub.s32 %s1803_s13, %s2400_s26  ;;  %p1964_p9 = por %p54_p7, %p53_p4 }
  0x2b   : > { %1471 = dma.hbm_to_vmem [thread:$0]  (!%p1469_p8), %s2358_s3, 1024, %s282_s20, [#allocation5], %s1814_s22, %s1814_s22, %s1815_s23  }
  0x2c   : > { %p39_p8 = scmp.ge.s32.totalorder %s2402_s30, 2  ;;  %p2361_p10 = scmp.eq.s32.totalorder %s1927_s16, 3 }
  0x2d   : > { %p2346_p12 = scmp.lt.s32.totalorder %s1811_s15, 4  ;;  %s301_s22 = sand.u32 1, %s1791_s10  }
  0x2e   : > { %p1970_p11 = por %p2361_p10, %p53_p4  ;;  %s2404_s30 = smov (%p39_p8, %s2402_s30), 0 }
  0x2f   : > { %2364 = sst [smem:[#allocation16_spill]] %s2404_s30  ;;  %s1365_s23 = sshll.u32 %s301_s22, 3 }
  0x30   : > { %s2362_s20 = scalar_select %p1970_p11, 1, 0 }
  0x31   : > { %s1980_s24 = ssub.s32 %s1807_s14, %s2404_s30  ;;  %s1366_s3 = sshll.u32 %s1803_s13, 1 }
  0x32   : > { %2363 = sst [smem:[#allocation15_spill]] %s2362_s20  ;;  %s43_s25 = sor.u32 %s42_s21, %s1980_s24 }
  0x33   : > { %p70_p13 = scmp.eq.s32.totalorder %s1980_s24, 0  ;;  %p44_p0 = scmp.eq.s32.totalorder %s43_s25, 0 }
  0x34   : > { %s1367_s26 = sshll.u32 %s1807_s14, 2  ;;  %s305_s7 = scalar_lea.vmem [#allocation2], %s1365_s23 }
  0x35   : > { %s314_s6 = sshll.u32 %s305_s7, 4  ;;  %s311_s20 = sadd.s32 %s1367_s26, %s1366_s3  ;;  %s315_s6 = int_to_ptr.vmem [resolvable:$true] %s314_s6 }
  0x36   : > { %s1987_s11 = scalar_select %p44_p0, %s1791_s10, %s46_s19  }
  0x37   : > { %s1368_s4 = sshll.u32 %s311_s20, 6  ;;  %p1993_p3 = pnand %p2346_p12, %p1964_p9 }
  0x38   : > { %s313_s21 = scalar_lea.hbm %s2334_s0, %s1368_s4  ;;  %s302_s25 = scalar_lea.sflag [#allocation3], %s301_s22 }
  0x39   : > { %p1659_p2 = pneg %p1993_p3  ;;  %s1670_s7 = scalar_lea.vmem %s315_s6, 128 }
  0x3a   : > { %p1671_p4 = scmp.ne.s32.totalorder %s315_s6, %s1670_s7  ;;  %s1816_s3 = smov [#allocation2]  }
  0x3b   : > { %s1675_s26 = sshll.u32 %s1816_s3, 4  ;;  %s1676_s26 = int_to_ptr.vmem [resolvable:$false] %s1675_s26 }
  0x3c   : > { %p1673_p8 = pnand %p1671_p4, %p1659_p2  ;;  %s1677_s8 = scalar_lea.vmem %s1676_s26, 256 }
  0x3d   : > { %p1678_p9 = scmp.lt.s32.totalorder %s315_s6, %s1676_s26  ;;  %p1679_p0 = scmp.lt.s32.totalorder %s1677_s8, %s1670_s7 }
  0x3e   : > { %p1674_p10 = pneg %p1673_p8 }
  0x3f   : > { %p1680_p12 = por %p1679_p0, %p1678_p9 }
  0x41   : > { %p1681_p1 = pnand %p1680_p12, %p1674_p10 }
  0x43   : > { %1684 = shalt.err (!%p1681_p1)
}
  0x44   : > { %s1817_s19 = smov 64   ;;  %s1818_s4 = smov 4  }
  0x45   : > { %1475 = dma.hbm_to_vmem [thread:$0]  (!%p1993_p3), %s313_s21, 128, %s315_s6, %s302_s25, %s1817_s19, %s1817_s19, %s1818_s4  }
  0x46   : > { %s72_s5 = sadd.s32 1, %s1779_s29  ;;  %p79_p1 = scmp.ne.s32.totalorder %s1779_s29, %s1775_s28 }
  0x47   : > { %s2010_s30 = scalar_select %p70_p13, %s1779_s29, %s72_s5  }
  0x48   : > { %p81_p12 = por %p79_p1, %p54_p7  ;;  %p85_p2 = scmp.ne.s32.totalorder %s1775_s28, %s1771_s27 }
  0x49   : > { %s324_s20 = sand.u32 1, %s1811_s15   ;;  %s326_s22 = sand.u32 1, %s1779_s29  }
  0x4a   : > { %p2366_p4 = scmp.eq.s32.totalorder %s1927_s16, 0  ;;  %s1369_s7 = sshll.u32 %s1807_s14, 4 }
  0x4b   : > { %s332_s2 = scalar_lea.hbm %s2335_s1, %s1369_s7  ;;  %s327_s6 = scalar_lea.vmem [#allocation4], %s326_s22 }
  0x4c   : > { %p2020_p8 = por %p85_p2, %p2366_p4  ;;  %s334_s21 = sshll.u32 %s327_s6, 4  ;;  %s335_s21 = int_to_ptr.vmem [resolvable:$true] %s334_s21 }
  0x4d   : > { %p2368_p13 = scmp.lt.s32.totalorder %s1811_s15, 4  ;;  %s325_s27 = scalar_lea.sflag [#allocation5], %s324_s20 }
  0x4e   : > { %s1698_s25 = scalar_lea.vmem %s335_s21, 16  ;;  %s1819_s8 = smov [#allocation4]  }
  0x4f   : > { %p2030_p3 = pnand %p2368_p13, %p81_p12  ;;  %p1699_p10 = scmp.ne.s32.totalorder %s335_s21, %s1698_s25 }
  0x50   : > { %s1703_s19 = sshll.u32 %s1819_s8, 4  ;;  %s1704_s19 = int_to_ptr.vmem [resolvable:$false] %s1703_s19 }
  0x51   : > { %p1687_p7 = pneg %p2030_p3  ;;  %s1705_s4 = scalar_lea.vmem %s1704_s19, 32 }
  0x52   : > { %p1706_p1 = scmp.lt.s32.totalorder %s335_s21, %s1704_s19  ;;  %p1707_p2 = scmp.lt.s32.totalorder %s1705_s4, %s1698_s25 }
  0x53   : > { %p1701_p9 = pnand %p1699_p10, %p1687_p7 }
  0x54   : > { %p1708_p4 = por %p1707_p2, %p1706_p1 }
  0x55   : > { %p1702_p0 = pneg %p1701_p9 }
  0x57   : > { %p1709_p11 = pnand %p1708_p4, %p1702_p0 }
  0x59   : > { %1712 = shalt.err (!%p1709_p11)
}
  0x5a   : > { %1478 = dma.hbm_to_vmem [thread:$0]  (!%p2030_p3), %s332_s2, 16, %s335_s21, %s325_s27  }
  0x5b   : > { %349 = sbr.rel (%p1940_p6) target bundleno = 1156 (0x484), region = 44  ;;  %s2041_s5 = sand.u32 (!%p1940_p6), 1, %s1787_s9  }
  0x5c   : > { %s1371_s20 = sshll.u32 (!%p1940_p6), %s2041_s5, 3  ;;  %s352_s22 = scalar_lea.sflag (!%p1940_p6), [#allocation3], %s2041_s5 }
  0x5d   : > { %s355_s7 = scalar_lea.vmem (!%p1940_p6), [#allocation2], %s1371_s20 }
  0x60   : > { %1758 = dma.done.wait (%p1936_p5), %s352_s22, 128  }
  0x61   : > { %1760 = vsyncadd (%p1936_p5), %s352_s22, 4294967168  ;;  %s360_s3 = sand.u32 1, %s1927_s16   ;;  %s362_s18 = sand.u32 1, %s1775_s28  }
  0x62   : > { %s361_s26 = scalar_lea.sflag [#allocation5], %s360_s3  ;;  %s2051_s2 = scalar_lea.vmem [#allocation4], %s362_s18 }
  0x63   : > { %1762 = dma.done.wait (%p2020_p8), %s361_s26, 16  }
  0x64   : > { %1764 = vsyncadd (%p2020_p8), %s361_s26, 4294967280  ;;  %p2370_p6 = scmp.eq.s32.totalorder %s1927_s16, 0 }
  0x66   : > { %1766 = dma.done.wait (%p2370_p6), [#allocation5], 1024   ;;  %p2371_p11 = pmov %p2370_p6 }
  0x67   : > { %v1457_v0 = vld [vmem:[%s355_s7] sm:$0xff]   ;;  %vm426_vm0 = vcmask 523264   ;;  %v1588_v18 = vld [vmem:[#allocation6 + $0x20] ss:$8 sps:$4 sm:$0xff]   ;;  %v1820_v19 = vmov 0   ;;  %s2372_s23 = sld [smem:[#allocation20_spill]]  ;;  %v457_v31 = vlaneseq }
  0x68   : > { %1768 = vsyncadd (%p2371_p11), [#allocation5], 4294966272  ;;  %v1458_v1 = vunpack.c.l.bf16 %v1457_v0  ;;  %v1459_v2 = vunpack.c.h.bf16 %v1457_v0  ;;  %v1583_v15 = vld [vmem:[#allocation6 + $0x34] ss:$8 sps:$4 sm:$0xff]   ;;  %v1585_v16 = vld [vmem:[#allocation6 + $0x30] ss:$8 sps:$4 sm:$0xff]   ;;  %557 = vmatprep.mubr.bf16.mxu0 %v1820_v19 }
  0x69   : > { %v1586_v17 = vld [vmem:[#allocation6 + $0x24] ss:$8 sps:$4 sm:$0xff]   ;;  %533 = vmatprep.subr.bf16.mxu0 %v1583_v15  ;;  %v1589_v20 = vld [vmem:[#allocation6 + $0x14] ss:$8 sps:$4 sm:$0xff]   ;;  %v1591_v21 = vld [vmem:[#allocation6 + $0x10] ss:$8 sps:$4 sm:$0xff]  }
  0x6a   : > { %v427_v3 = vsel %vm426_vm0, %v1458_v1, 0.0  ;;  %v430_v4 = vsel %vm426_vm0, %v1459_v2, 0.0  ;;  %534 = vmatpush1.bf16.msra.mxu0 %v1585_v16  ;;  %v1592_v22 = vld [vmem:[#allocation6 + $0x4] ss:$8 sps:$4 sm:$0xff]   ;;  %v1594_v23 = vld [vmem:[#allocation6] ss:$8 sps:$4 sm:$0xff]  }
  0x6b   : > { %428 = vadd.xlane.f32.xlu0 %v427_v3  ;;  %535 = vmatprep.subr.bf16.mxu0 %v1586_v17  ;;  %s1821_s6 = smov 64   ;;  %p415_p5 = scmp.lt.s32.totalorder %s1799_s12, 1  ;;  %v458_v32 = vshrl.u32 %v457_v31, 7  ;;  %v1376_v42 = vld [vmem:[%s2051_s2] ss:$0 sm:$0xff]  ;;  %vm606_vm1 = vcmask 125952  }
  0x6c   : > { %s2373_s25 = sld [smem:[#allocation17_spill]]  ;;  %s2080_s19 = sshll.u32 %s2041_s5, 5  ;;  %vm572_vm2 = vcmask 130048  }
  0x6d   : > { %v2068_v24 = vld [vmem:[%s2372_s23] ss:$0 sm:$0xff]  ;;  %s416_s21 = scalar_select %p415_p5, %s1799_s12, 1  ;;  %v459_v35 = vsub.s32 0, %v458_v32 }
  0x6e   : > { %536 = vmatpush1.bf16.msra.mxu0 %v1588_v18  ;;  %s1822_s4 = smov 112   ;;  %s2093_s20 = scalar_lea.vmem [#allocation9], %s2080_s19 }
  0x6f   : > { %431 = vadd.xlane.f32.xlu0 %v430_v4  ;;  %537 = vmatprep.subr.bf16.mxu0 %v1589_v20  ;;  %s1823_s5 = smov 80   ;;  %s1824_s22 = smov 96  }
  0x70   : > { %s1825_s7 = smov 48   ;;  %s1826_s3 = smov 32  }
  0x71   : > { %s1827_s18 = smov 16   ;;  %s2374_s16 = sld [smem:[#allocation19_spill]] }
  0x72   : > { %538 = vmatpush1.bf16.msra.mxu0 %v1591_v21  ;;  %s417_s8 = scalar_lea.vmem %s2373_s25, %s416_s21  ;;  %s2151_s17 = scalar_lea.vmem [#allocation7], %s2080_s19 }
  0x73   : > { %539 = vmatprep.subr.bf16.mxu0 %v1592_v22  ;;  %v454_v33 = vld [vmem:[%s417_s8] sm:$0x1]  ;;  %s2234_s23 = scalar_lea.vmem [#allocation8], %s2080_s19 }
  0x74   : > { %v455_v34 = vadd.f32 1.0, %v454_v33 }
  0x76   : > { %540 = vmatpush1.bf16.msra.mxu0 %v1594_v23  ;;  %v460_v38 = vrot.slane %v455_v34, %v459_v35 }
  0x77   : > { %v2115_v55 = vld [vmem:[%s2374_s16] ss:$0 sm:$0xff] }
  0x85   : > { %636 = vrot.lane.b32.xlu0 %v2068_v24, %s1821_s6 }
  0xf4   : > { %v429_v5 = vpop.xlane.xlu0 %428 }
  0xf5   : > { %v434_v6 = vmul.f32 0.015625, %v429_v5 }
  0xf7   : > { %v436_v7 = vsub.f32 %v1458_v1, %v434_v6 }
  0xf8   : > { %v432_v8 = vpop.xlane.xlu0 %431 }
  0xf9   : > { %v435_v9 = vmul.f32 0.015625, %v432_v8  ;;  %v438_v10 = vmul.f32 %v436_v7, %v436_v7 }
  0xfb   : > { %v437_v11 = vsub.f32 %v1459_v2, %v435_v9  ;;  %v440_v12 = vsel %vm426_vm0, %v438_v10, 0.0 }
  0xfc   : > { %441 = vadd.xlane.f32.xlu1 %v440_v12  ;;  %v2128_v58 = vpop.permute.xlu0 %636 }
  0xfd   : > { %v439_v13 = vmul.f32 %v437_v11, %v437_v11 }
  0xff   : > { %v443_v14 = vsel %vm426_vm0, %v439_v13, 0.0 }
 0x100   : > { %444 = vadd.xlane.f32.xlu1 %v443_v14 }
 0x185   : > { %v442_v25 = vpop.xlane.xlu1 %441 }
 0x186   : > { %v446_v26 = vmul.f32 0.015625, %v442_v25 }
 0x188   : > { %v448_v27 = vadd.f32 1e-06, %v446_v26 }
 0x189   : > { %v445_v28 = vpop.xlane.xlu1 %444 }
 0x18a   : > { %1595 = vrsqrt.f32 %v448_v27  ;;  %v447_v29 = vmul.f32 0.015625, %v445_v28 }
 0x18c   : > { %v449_v30 = vadd.f32 1e-06, %v447_v29 }
 0x18e   : > { %1597 = vrsqrt.f32 %v449_v30 }
 0x197   : > { %v1596_v36 = vpop.eup %1595 }
 0x198   : > { %v452_v37 = vmul.f32 %v1596_v36, %v436_v7 }
 0x19a   : > { %v462_v41 = vmul.f32 %v460_v38, %v452_v37 }
 0x19b   : > { %v1598_v39 = vpop.eup %1597 }
 0x19c   : > { %v453_v40 = vmul.f32 %v1598_v39, %v437_v11  ;;  %v471_v44 = vadd.f32 %v1376_v42, %v462_v41 }
 0x19e   : > { %v463_v43 = vmul.f32 %v460_v38, %v453_v40 }
 0x1a0   : > { %v472_v45 = vadd.f32 %v1376_v42, %v463_v43 }
 0x1a2   : > { %v473_v46 = vpack.c.bf16 %v472_v45, %v471_v44 }
 0x1a4   : > { %1385 = vmatmul.mubr.msk.bf16.vlgmr.msra.gmra.mxu0 %vm426_vm0, %v473_v46 }
 0x264   : > { %v2082_v47 = vpop.f32.mrf.mxu0 }
 0x265   : > { %v570_v48 = vmul.f32 %v2082_v47, %v2082_v47 }
 0x266   : > { %v561_v49 = vpop.f32.mrf.mxu0 }
 0x267   : > { %v2086_v50 = vpack.c.bf16 %v561_v49, %v561_v49  ;;  %665 = vrot.lane.b32.xlu1 %v570_v48, %s1822_s4  ;;  %611 = vrot.lane.b32.xlu0 %v570_v48, %s1821_s6  ;;  %v573_v56 = vsel %vm572_vm2, %v570_v48, 0.0 }
 0x268   : > { %v2090_v51 = vpop.f32.mrf.mxu0 }
 0x269   : > { %663 = vst.msk [vmem:[%s2093_s20] sm:$0xf] %vm606_vm1, %v2086_v50  ;;  %v571_v54 = vmul.f32 %v2090_v51, %v2090_v51 }
 0x26a   : > { %v565_v52 = vpop.f32.mrf.mxu0 }
 0x26b   : > { %v2098_v53 = vpack.c.bf16 %v565_v52, %v565_v52  ;;  %847 = vrot.lane.b32.xlu1 %v570_v48, %s1823_s5  ;;  %756 = vrot.lane.b32.xlu0 %v570_v48, %s1824_s22  ;;  %v576_v57 = vsel %vm572_vm2, %v571_v54, 0.0 }
 0x26d   : > { %664 = vst.msk [vmem:[%s2093_s20 + $0x4] sm:$0xf] %vm606_vm1, %v2098_v53 }
 0x26f   : > { %707 = vrot.lane.b32.xlu1 %v570_v48, %s1825_s7 }
 0x273   : > { %798 = vrot.lane.b32.xlu1 %v570_v48, %s1826_s3 }
 0x277   : > { %889 = vrot.lane.b32.xlu1 %v570_v48, %s1827_s18 }
 0x27b   : > { %613 = vrot.lane.b32.xlu1 %v571_v54, %s1821_s6 }
 0x27f   : > { %758 = vrot.lane.b32.xlu1 %v571_v54, %s1824_s22 }
 0x283   : > { %685 = vrot.lane.b32.xlu1 %v2115_v55, %s1827_s18 }
 0x28a   : > { %574 = vadd.xlane.f32.xlu0 %v573_v56 }
 0x2a0   : > { %667 = vrot.lane.b32.xlu0 %v571_v54, %s1822_s4 }
 0x2a4   : > { %849 = vrot.lane.b32.xlu0 %v571_v54, %s1823_s5 }
 0x2a7   : > { %577 = vadd.xlane.f32.xlu1 %v576_v57 }
 0x2a8   : > { %709 = vrot.lane.b32.xlu0 %v571_v54, %s1825_s7 }
 0x2ac   : > { %800 = vrot.lane.b32.xlu0 %v571_v54, %s1826_s3 }
 0x2b0   : > { %891 = vrot.lane.b32.xlu0 %v571_v54, %s1827_s18 }
 0x2b4   : > { %727 = vrot.lane.b32.xlu0 %v2068_v24, %s1823_s5 }
 0x2d9   : > { %v666_v59 = vpop.permute.xlu1 %665  ;;  %v612_v60 = vpop.permute.xlu0 %611 }
 0x2da   : > { %v617_v61 = vsel %vm572_vm2, %v612_v60, 0.0  ;;  %v671_v63 = vsel %vm572_vm2, %v666_v59, 0.0 }
 0x2db   : > { %618 = vadd.xlane.f32.xlu1 %v617_v61 }
 0x2dd   : > { %v848_v62 = vpop.permute.xlu1 %847  ;;  %v757_v0 = vpop.permute.xlu0 %756 }
 0x2de   : > { %v762_v3 = vsel %vm572_vm2, %v757_v0, 0.0  ;;  %v853_v5 = vsel %vm572_vm2, %v848_v62, 0.0 }
 0x2df   : > { %672 = vadd.xlane.f32.xlu1 %v671_v63 }
 0x2e1   : > { %v708_v1 = vpop.permute.xlu1 %707 }
 0x2e2   : > { %v713_v2 = vsel %vm572_vm2, %v708_v1, 0.0 }
 0x2e3   : > { %714 = vadd.xlane.f32.xlu0 %v713_v2  ;;  %763 = vadd.xlane.f32.xlu1 %v762_v3 }
 0x2e5   : > { %v799_v4 = vpop.permute.xlu1 %798 }
 0x2e6   : > { %v804_v16 = vsel %vm572_vm2, %v799_v4, 0.0 }
 0x2e7   : > { %854 = vadd.xlane.f32.xlu1 %v853_v5 }
 0x2e9   : > { %v890_v6 = vpop.permute.xlu1 %889 }
 0x2ea   : > { %v895_v7 = vsel %vm572_vm2, %v890_v6, 0.0 }
 0x2eb   : > { %896 = vadd.xlane.f32.xlu1 %v895_v7 }
 0x2ed   : > { %v614_v8 = vpop.permute.xlu1 %613 }
 0x2ee   : > { %v620_v9 = vsel %vm572_vm2, %v614_v8, 0.0 }
 0x2ef   : > { %621 = vadd.xlane.f32.xlu0 %v620_v9 }
 0x2f1   : > { %v759_v19 = vpop.permute.xlu1 %758 }
 0x2f2   : > { %v765_v22 = vsel %vm572_vm2, %v759_v19, 0.0 }
 0x2f5   : > { %v2148_v29 = vpop.permute.xlu1 %685 }
 0x2fc   : > { %776 = vrot.lane.b32.xlu1 %v2115_v55, %s1826_s3 }
 0x300   : > { %818 = vrot.lane.b32.xlu1 %v2068_v24, %s1824_s22 }
 0x313   : > { %v575_v10 = vpop.xlane.xlu0 %574 }
 0x314   : > { %v580_v11 = vmul.f32 0.0625, %v575_v10 }
 0x316   : > { %v582_v12 = vadd.f32 1e-06, %v580_v11 }
 0x317   : > { %v668_v13 = vpop.permute.xlu0 %667 }
 0x318   : > { %1599 = vrsqrt.f32 %v582_v12  ;;  %v674_v14 = vsel %vm572_vm2, %v668_v13, 0.0 }
 0x319   : > { %675 = vadd.xlane.f32.xlu0 %v674_v14 }
 0x31b   : > { %v850_v15 = vpop.permute.xlu0 %849 }
 0x31c   : > { %v856_v27 = vsel %vm572_vm2, %v850_v15, 0.0 }
 0x31d   : > { %805 = vadd.xlane.f32.xlu0 %v804_v16 }
 0x31f   : > { %v710_v17 = vpop.permute.xlu0 %709 }
 0x320   : > { %v716_v18 = vsel %vm572_vm2, %v710_v17, 0.0 }
 0x323   : > { %v801_v26 = vpop.permute.xlu0 %800 }
 0x324   : > { %717 = vadd.xlane.f32.xlu1 %v716_v18  ;;  %v807_v30 = vsel %vm572_vm2, %v801_v26, 0.0 }
 0x325   : > { %v1600_v20 = vpop.eup %1599 }
 0x326   : > { %v586_v21 = vmul.f32 %v1600_v20, %v2082_v47 }
 0x327   : > { %v892_v31 = vpop.permute.xlu0 %891 }
 0x328   : > { %v594_v23 = vmul.f32 %v2115_v55, %v586_v21  ;;  %766 = vadd.xlane.f32.xlu1 %v765_v22  ;;  %v898_v35 = vsel %vm572_vm2, %v892_v31, 0.0 }
 0x32a   : > { %v596_v25 = vmul.f32 0.25, %v594_v23 }
 0x32b   : > { %v2173_v43 = vpop.permute.xlu0 %727 }
 0x32c   : > { %v1438_v28 = vpack.c.bf16 %v596_v25, %v596_v25  ;;  %857 = vadd.xlane.f32.xlu1 %v856_v27 }
 0x32e   : > { %607 = vst.msk [vmem:[%s2151_s17] sm:$0xf] %vm606_vm1, %v1438_v28 }
 0x330   : > { %v578_v32 = vpop.xlane.xlu1 %577  ;;  %808 = vadd.xlane.f32.xlu1 %v807_v30 }
 0x331   : > { %v581_v33 = vmul.f32 0.0625, %v578_v32 }
 0x333   : > { %v583_v34 = vadd.f32 1e-06, %v581_v33  ;;  %867 = vrot.lane.b32.xlu0 %v2115_v55, %s1825_s7 }
 0x334   : > { %899 = vadd.xlane.f32.xlu1 %v898_v35 }
 0x335   : > { %1601 = vrsqrt.f32 %v583_v34 }
 0x337   : > { %838 = vrot.lane.b32.xlu0 %v2086_v50, %s1824_s22 }
 0x342   : > { %v1602_v36 = vpop.eup %1601 }
 0x343   : > { %v587_v37 = vmul.f32 %v1602_v36, %v2090_v51 }
 0x345   : > { %v595_v38 = vmul.f32 %v2115_v55, %v587_v37  ;;  %909 = vrot.lane.b32.xlu1 %v2068_v24, %s1822_s4 }
 0x347   : > { %v597_v39 = vmul.f32 0.25, %v595_v38 }
 0x349   : > { %v1439_v40 = vpack.c.bf16 %v597_v39, %v597_v39  ;;  %747 = vrot.lane.b32.xlu1 %v2086_v50, %s1822_s4 }
 0x34b   : > { %608 = vst.msk [vmem:[%s2151_s17 + $0x4] sm:$0xf] %vm606_vm1, %v1439_v40 }
 0x34d   : > { %749 = vrot.lane.b32.xlu1 %v2098_v53, %s1822_s4 }
 0x351   : > { %840 = vrot.lane.b32.xlu1 %v2098_v53, %s1824_s22 }
 0x364   : > { %v619_v41 = vpop.xlane.xlu1 %618 }
 0x365   : > { %v623_v42 = vmul.f32 0.0625, %v619_v41 }
 0x367   : > { %v625_v44 = vadd.f32 1e-06, %v623_v42 }
 0x368   : > { %v673_v0 = vpop.xlane.xlu1 %672 }
 0x369   : > { %1603 = vrsqrt.f32 %v625_v44  ;;  %v677_v7 = vmul.f32 0.0625, %v673_v0 }
 0x36b   : > { %v679_v10 = vadd.f32 1e-06, %v677_v7 }
 0x36c   : > { %v715_v24 = vpop.xlane.xlu0 %714  ;;  %v764_v4 = vpop.xlane.xlu1 %763 }
 0x36d   : > { %v719_v45 = vmul.f32 0.0625, %v715_v24  ;;  %v768_v11 = vmul.f32 0.0625, %v764_v4 }
 0x36f   : > { %v721_v46 = vadd.f32 1e-06, %v719_v45 }
 0x370   : > { %v855_v5 = vpop.xlane.xlu1 %854 }
 0x371   : > { %1605 = vrsqrt.f32 %v721_v46  ;;  %v859_v19 = vmul.f32 0.0625, %v855_v5 }
 0x373   : > { %v861_v25 = vadd.f32 1e-06, %v859_v19 }
 0x374   : > { %v897_v6 = vpop.xlane.xlu1 %896 }
 0x375   : > { %v901_v13 = vmul.f32 0.0625, %v897_v6 }
 0x376   : > { %v1604_v48 = vpop.eup %1603 }
 0x377   : > { %v629_v49 = vmul.f32 %v1604_v48, %v2082_v47  ;;  %v903_v18 = vadd.f32 1e-06, %v901_v13 }
 0x378   : > { %v622_v52 = vpop.xlane.xlu0 %621  ;;  %v2184_v9 = vpop.permute.xlu1 %776 }
 0x379   : > { %v624_v54 = vmul.f32 0.0625, %v622_v52  ;;  %v639_v55 = vmul.f32 %v2128_v58, %v629_v49 }
 0x37b   : > { %v626_v56 = vadd.f32 1e-06, %v624_v54  ;;  %v1440_v57 = vpack.c.bf16 %v639_v55, %v639_v55 }
 0x37c   : > { %v2186_v15 = vpop.permute.xlu1 %818 }
 0x37d   : > { %1607 = vrsqrt.f32 %v626_v56  ;;  %647 = vrot.lane.b32.xlu1 %v1440_v57, %s1821_s6 }
 0x37e   : > { %v1606_v59 = vpop.eup %1605  ;;  %1609 = vrsqrt.f32 %v679_v10 }
 0x37f   : > { %v725_v60 = vmul.f32 %v1606_v59, %v2082_v47 }
 0x381   : > { %v730_v61 = vmul.f32 %v2173_v43, %v725_v60 }
 0x383   : > { %v1446_v62 = vpack.c.bf16 %v730_v61, %v730_v61 }
 0x385   : > { %738 = vrot.lane.b32.xlu1 %v1446_v62, %s1825_s7 }
 0x38a   : > { %v1608_v63 = vpop.eup %1607 }
 0x38b   : > { %v630_v1 = vmul.f32 %v1608_v63, %v2090_v51  ;;  %v1610_v30 = vpop.eup %1609 }
 0x38c   : > { %v683_v39 = vmul.f32 %v1610_v30, %v2082_v47 }
 0x38d   : > { %v640_v2 = vmul.f32 %v2128_v58, %v630_v1  ;;  %v770_v58 = vadd.f32 1e-06, %v768_v11 }
 0x38e   : > { %v688_v54 = vmul.f32 %v2148_v29, %v683_v39 }
 0x38f   : > { %v1441_v3 = vpack.c.bf16 %v640_v2, %v640_v2 }
 0x390   : > { %v690_v63 = vmul.f32 0.25, %v688_v54 }
 0x391   : > { %649 = vrot.lane.b32.xlu1 %v1441_v3, %s1821_s6  ;;  %s2375_s6 = sld [smem:[#allocation15_spill]] }
 0x392   : > { %v1444_v6 = vpack.c.bf16 %v690_v63, %v690_v63 }
 0x397   : > { %p2376_p12 = scmp.ne.s32.totalorder %s2375_s6, 0 }
 0x398   : > { %s2377_s21 = sld [smem:[#allocation13_spill]] (%p2376_p12)  ;;  %s1428_s27 = sshll.u32 (%p2376_p12), %s1799_s12, 4 }
 0x39e   : > { %s1427_s24 = sshll.u32 (%p2376_p12), %s2377_s21, 1 }
 0x39f   : > { %s955_s25 = sadd.s32 (%p2376_p12), %s1428_s27, %s1427_s24 }
 0x3a0   : > { %s1429_s8 = sshll.u32 (%p2376_p12), %s955_s25, 2 }
 0x3a2   : > { %v676_v8 = vpop.xlane.xlu0 %675 }
 0x3a3   : > { %v678_v27 = vmul.f32 0.0625, %v676_v8 }
 0x3a5   : > { %v680_v32 = vadd.f32 1e-06, %v678_v27 }
 0x3a6   : > { %v806_v12 = vpop.xlane.xlu0 %805 }
 0x3a7   : > { %v810_v14 = vmul.f32 0.0625, %v806_v12 }
 0x3a9   : > { %v812_v16 = vadd.f32 1e-06, %v810_v14 }
 0x3aa   : > { %v2188_v17 = vpop.permute.xlu0 %867 }
 0x3ab   : > { %1611 = vrsqrt.f32 %v812_v16 }
 0x3ac   : > { %1613 = vrsqrt.f32 %v770_v58 }
 0x3ad   : > { %v718_v20 = vpop.xlane.xlu1 %717  ;;  %1615 = vrsqrt.f32 %v903_v18 }
 0x3ae   : > { %v720_v21 = vmul.f32 0.0625, %v718_v20  ;;  %v839_v22 = vpop.permute.xlu0 %838 }
 0x3af   : > { %1412 = vst.msk [vmem:[%s2093_s20 + $0x10] sm:$0xf] %vm606_vm1, %v839_v22 }
 0x3b0   : > { %v722_v23 = vadd.f32 1e-06, %v720_v21 }
 0x3b1   : > { %v767_v26 = vpop.xlane.xlu1 %766 }
 0x3b2   : > { %1617 = vrsqrt.f32 %v722_v23  ;;  %v769_v33 = vmul.f32 0.0625, %v767_v26 }
 0x3b3   : > { %1619 = vrsqrt.f32 %v861_v25 }
 0x3b4   : > { %1621 = vrsqrt.f32 %v680_v32  ;;  %v771_v41 = vadd.f32 1e-06, %v769_v33 }
 0x3b5   : > { %v858_v28 = vpop.xlane.xlu1 %857 }
 0x3b6   : > { %v860_v42 = vmul.f32 0.0625, %v858_v28 }
 0x3b8   : > { %v1612_v31 = vpop.eup %1611  ;;  %v862_v55 = vadd.f32 1e-06, %v860_v42 }
 0x3b9   : > { %v809_v34 = vpop.xlane.xlu1 %808  ;;  %v816_v35 = vmul.f32 %v1612_v31, %v2082_v47  ;;  %v1614_v37 = vpop.eup %1613 }
 0x3ba   : > { %v811_v36 = vmul.f32 0.0625, %v809_v34  ;;  %v1616_v40 = vpop.eup %1615  ;;  %v774_v49 = vmul.f32 %v1614_v37, %v2082_v47 }
 0x3bb   : > { %v821_v38 = vmul.f32 %v2186_v15, %v816_v35  ;;  %v907_v52 = vmul.f32 %v1616_v40, %v2082_v47 }
 0x3bc   : > { %v813_v44 = vadd.f32 1e-06, %v811_v36  ;;  %v779_v0 = vmul.f32 %v2184_v9, %v774_v49 }
 0x3bd   : > { %v900_v24 = vpop.xlane.xlu1 %899  ;;  %v1450_v45 = vpack.c.bf16 %v821_v38, %v821_v38 }
 0x3be   : > { %1623 = vrsqrt.f32 %v813_v44  ;;  %v902_v46 = vmul.f32 0.0625, %v900_v24 }
 0x3bf   : > { %v1618_v48 = vpop.eup %1617  ;;  %829 = vrot.lane.b32.xlu0 %v1450_v45, %s1826_s3  ;;  %1625 = vrsqrt.f32 %v771_v41 }
 0x3c0   : > { %v904_v56 = vadd.f32 1e-06, %v902_v46  ;;  %v726_v57 = vmul.f32 %v1618_v48, %v2090_v51  ;;  %v1620_v60 = vpop.eup %1619  ;;  %v974_v48 = vld [vmem:[%s2151_s17] sm:$0xff] (%p2376_p12)  }
 0x3c1   : > { %v910_v59 = vpop.permute.xlu1 %909  ;;  %v865_v3 = vmul.f32 %v1620_v60, %v2082_v47  ;;  %v1622_v7 = vpop.eup %1621 }
 0x3c2   : > { %1627 = vrsqrt.f32 %v904_v56  ;;  %v912_v61 = vmul.f32 %v910_v59, %v907_v52  ;;  %v731_v62 = vmul.f32 %v2173_v43, %v726_v57  ;;  %v781_v43 = vmul.f32 0.25, %v779_v0 }
 0x3c3   : > { %1629 = vrsqrt.f32 %v862_v55  ;;  %v870_v5 = vmul.f32 %v2188_v17, %v865_v3  ;;  %v684_v13 = vmul.f32 %v1622_v7, %v2090_v51 }
 0x3c4   : > { %v1454_v1 = vpack.c.bf16 %v912_v61, %v912_v61  ;;  %v1447_v2 = vpack.c.bf16 %v731_v62, %v731_v62  ;;  %v1448_v11 = vpack.c.bf16 %v781_v43, %v781_v43 }
 0x3c5   : > { %v748_v4 = vpop.permute.xlu1 %747  ;;  %v872_v47 = vmul.f32 0.25, %v870_v5  ;;  %v689_v22 = vmul.f32 %v2148_v29, %v684_v13 }
 0x3c6   : > { %1402 = vst.msk [vmem:[%s2093_s20 + $0x8] sm:$0xf] %vm606_vm1, %v748_v4  ;;  %740 = vrot.lane.b32.xlu1 %v1447_v2, %s1825_s7  ;;  %920 = vrot.lane.b32.xlu0 %v1454_v1, %s1827_s18 }
 0x3c7   : > { %v1452_v19 = vpack.c.bf16 %v872_v47, %v872_v47  ;;  %v691_v28 = vmul.f32 0.25, %v689_v22 }
 0x3c9   : > { %v750_v8 = vpop.permute.xlu1 %749  ;;  %v1445_v29 = vpack.c.bf16 %v691_v28, %v691_v28 }
 0x3ca   : > { %1403 = vst.msk [vmem:[%s2093_s20 + $0xc] sm:$0xf] %vm606_vm1, %v750_v8  ;;  %698 = vrot.lane.b32.xlu0 %v1444_v6, %s1822_s4 }
 0x3cb   : > { %v1624_v10 = vpop.eup %1623 }
 0x3cc   : > { %v817_v12 = vmul.f32 %v1624_v10, %v2090_v51  ;;  %v1626_v14 = vpop.eup %1625 }
 0x3cd   : > { %v841_v16 = vpop.permute.xlu1 %840  ;;  %v775_v23 = vmul.f32 %v1626_v14, %v2090_v51 }
 0x3ce   : > { %1413 = vst.msk [vmem:[%s2093_s20 + $0x14] sm:$0xf] %vm606_vm1, %v841_v16  ;;  %789 = vrot.lane.b32.xlu0 %v1448_v11, %s1824_s22  ;;  %v822_v58 = vmul.f32 %v2186_v15, %v817_v12 }
 0x3cf   : > { %v1628_v18 = vpop.eup %1627  ;;  %v780_v15 = vmul.f32 %v2184_v9, %v775_v23 }
 0x3d0   : > { %v908_v20 = vmul.f32 %v1628_v18, %v2090_v51  ;;  %v1451_v21 = vpack.c.bf16 %v822_v58, %v822_v58  ;;  %v1630_v25 = vpop.eup %1629 }
 0x3d1   : > { %v866_v30 = vmul.f32 %v1630_v25, %v2090_v51  ;;  %v782_v31 = vmul.f32 0.25, %v780_v15 }
 0x3d2   : > { %v913_v26 = vmul.f32 %v910_v59, %v908_v20  ;;  %831 = vrot.lane.b32.xlu1 %v1451_v21, %s1826_s3  ;;  %880 = vrot.lane.b32.xlu0 %v1452_v19, %s1823_s5 }
 0x3d3   : > { %v871_v32 = vmul.f32 %v2188_v17, %v866_v30  ;;  %v1449_v33 = vpack.c.bf16 %v782_v31, %v782_v31 }
 0x3d4   : > { %v1455_v27 = vpack.c.bf16 %v913_v26, %v913_v26 }
 0x3d5   : > { %v873_v34 = vmul.f32 0.25, %v871_v32 }
 0x3d6   : > { %922 = vrot.lane.b32.xlu1 %v1455_v27, %s1827_s18  ;;  %929 = vrot.lane.b32.xlu0 %v2086_v50, %s1823_s5 }
 0x3d7   : > { %v1453_v35 = vpack.c.bf16 %v873_v34, %v873_v34 }
 0x3da   : > { %700 = vrot.lane.b32.xlu1 %v1445_v29, %s1822_s4 }
 0x3de   : > { %791 = vrot.lane.b32.xlu1 %v1449_v33, %s1824_s22 }
 0x3e2   : > { %882 = vrot.lane.b32.xlu1 %v1453_v35, %s1823_s5 }
 0x3e6   : > { %931 = vrot.lane.b32.xlu1 %v2098_v53, %s1823_s5  ;;  %s2378_s5 = sld [smem:[#allocation21_spill]] (%p2376_p12) }
 0x3ec   : > { %s957_s22 = scalar_lea.vmem (%p2376_p12), %s2378_s5, %s1429_s8 }
 0x3ed   : > { %975 = vst [vmem:[%s957_s22] sm:$0xff] (%p2376_p12), %v974_v48  }
 0x3ef   : > { %v648_v51 = vpop.permute.xlu1 %647 }
 0x3f0   : > { %653 = vst.msk [vmem:[%s2234_s23] sm:$0xf] %vm606_vm1, %v648_v51 }
 0x3f7   : > { %v739_v50 = vpop.permute.xlu1 %738 }
 0x3f8   : > { %1400 = vst.msk [vmem:[%s2234_s23 + $0x8] sm:$0xf] %vm606_vm1, %v739_v50 }
 0x403   : > { %v650_v9 = vpop.permute.xlu1 %649 }
 0x404   : > { %654 = vst.msk [vmem:[%s2234_s23 + $0x4] sm:$0xf] %vm606_vm1, %v650_v9 }
 0x431   : > { %v830_v53 = vpop.permute.xlu0 %829 }
 0x432   : > { %1410 = vst.msk [vmem:[%s2234_s23 + $0x10] sm:$0xf] %vm606_vm1, %v830_v53 }
 0x438   : > { %v741_v17 = vpop.permute.xlu1 %740  ;;  %v921_v36 = vpop.permute.xlu0 %920 }
 0x439   : > { %1401 = vst.msk [vmem:[%s2234_s23 + $0xc] sm:$0xf] %vm606_vm1, %v741_v17  ;;  %1420 = vst.msk [vmem:[%s2234_s23 + $0x18] sm:$0xf] %vm606_vm1, %v921_v36 }
 0x43c   : > { %v699_v37 = vpop.permute.xlu0 %698 }
 0x43d   : > { %1396 = vst.msk [vmem:[%s2151_s17 + $0x8] sm:$0xf] %vm606_vm1, %v699_v37 }
 0x440   : > { %v790_v38 = vpop.permute.xlu0 %789 }
 0x441   : > { %1406 = vst.msk [vmem:[%s2151_s17 + $0x10] sm:$0xf] %vm606_vm1, %v790_v38 }
 0x444   : > { %v832_v39 = vpop.permute.xlu1 %831  ;;  %v881_v40 = vpop.permute.xlu0 %880 }
 0x445   : > { %1411 = vst.msk [vmem:[%s2234_s23 + $0x14] sm:$0xf] %vm606_vm1, %v832_v39  ;;  %1416 = vst.msk [vmem:[%s2151_s17 + $0x18] sm:$0xf] %vm606_vm1, %v881_v40 }
 0x448   : > { %v923_v41 = vpop.permute.xlu1 %922  ;;  %v930_v42 = vpop.permute.xlu0 %929 }
 0x449   : > { %1421 = vst.msk [vmem:[%s2234_s23 + $0x1c] sm:$0xf] %vm606_vm1, %v923_v41  ;;  %1422 = vst.msk [vmem:[%s2093_s20 + $0x18] sm:$0xf] %vm606_vm1, %v930_v42 }
 0x44c   : > { %v701_v44 = vpop.permute.xlu1 %700 }
 0x44d   : > { %1397 = vst.msk [vmem:[%s2151_s17 + $0xc] sm:$0xf] %vm606_vm1, %v701_v44 }
 0x450   : > { %v792_v24 = vpop.permute.xlu1 %791 }
 0x451   : > { %1407 = vst.msk [vmem:[%s2151_s17 + $0x14] sm:$0xf] %vm606_vm1, %v792_v24 }
 0x454   : > { %v883_v45 = vpop.permute.xlu1 %882  ;;  %v978_v49 = vld [vmem:[%s2151_s17 + $0x8] sm:$0xff] (%p2376_p12)  }
 0x455   : > { %1417 = vst.msk [vmem:[%s2151_s17 + $0x1c] sm:$0xf] %vm606_vm1, %v883_v45  ;;  %952 = sbr.rel (!%p2376_p12) target bundleno = 1118 (0x45e), region = 60  ;;  %979 = vst [vmem:[%s957_s22 + $0x10] sm:$0xff] (%p2376_p12), %v978_v49  }
 0x458   : > { %v932_v46 = vpop.permute.xlu1 %931  ;;  %v982_v52 = vld [vmem:[%s2151_s17 + $0x10] sm:$0xff] (%p2376_p12)  }
 0x459   : > { %1423 = vst.msk [vmem:[%s2093_s20 + $0x1c] sm:$0xf] %vm606_vm1, %v932_v46  ;;  %983 = vst [vmem:[%s957_s22 + $0x20] sm:$0xff] (%p2376_p12), %v982_v52  }
 0x45c   : > { %v986_v54 = vld [vmem:[%s2151_s17 + $0x18] sm:$0xff]  }
 0x45d   : > { %987 = vst [vmem:[%s957_s22 + $0x30] sm:$0xff] %v986_v54  }
 0x45e PF: > { %s2379_s7 = sld [smem:[#allocation15_spill]] }
 0x464   : > { %p2380_p8 = scmp.ne.s32.totalorder %s2379_s7, 0 }
 0x465   : > { %s2381_s3 = sld [smem:[#allocation13_spill]] (%p2380_p8)  ;;  %s1431_s26 = sshll.u32 (%p2380_p8), %s1799_s12, 4  ;;  %v1051_v55 = vld [vmem:[%s2234_s23] sm:$0xff] (%p2380_p8)   ;;  %v1055_v56 = vld [vmem:[%s2234_s23 + $0x8] sm:$0xff] (%p2380_p8)   ;;  %v1059_v57 = vld [vmem:[%s2234_s23 + $0x10] sm:$0xff] (%p2380_p8)  }
 0x466   : > { %1029 = sbr.rel (!%p2380_p8) target bundleno = 1137 (0x471), region = 101  ;;  %v1063_v59 = vld [vmem:[%s2234_s23 + $0x18] sm:$0xff] (%p2380_p8)   ;;  %s2382_s21 = sld [smem:[#allocation22_spill]] (%p2380_p8) }
 0x46b   : > { %s1430_s18 = sshll.u32 %s2381_s3, 1 }
 0x46c   : > { %s1032_s2 = sadd.s32 %s1431_s26, %s1430_s18 }
 0x46d   : > { %s1432_s16 = sshll.u32 %s1032_s2, 2 }
 0x46e   : > { %s1034_s24 = scalar_lea.vmem %s2382_s21, %s1432_s16 }
 0x46f   : > { %1052 = vst [vmem:[%s1034_s24] sm:$0xff] %v1051_v55   ;;  %1056 = vst [vmem:[%s1034_s24 + $0x10] sm:$0xff] %v1055_v56  }
 0x470   : > { %1060 = vst [vmem:[%s1034_s24 + $0x20] sm:$0xff] %v1059_v57   ;;  %1064 = vst [vmem:[%s1034_s24 + $0x30] sm:$0xff] %v1063_v59  }
 0x471 PF: > { %s2383_s27 = sld [smem:[#allocation15_spill]] }
 0x477   : > { %p2384_p13 = scmp.ne.s32.totalorder %s2383_s27, 0 }
 0x478   : > { %s2385_s25 = sld [smem:[#allocation13_spill]] (%p2384_p13)  ;;  %s1434_s8 = sshll.u32 (%p2384_p13), %s1799_s12, 4  ;;  %v1128_v60 = vld [vmem:[%s2093_s20] sm:$0xff] (%p2384_p13)   ;;  %v1132_v61 = vld [vmem:[%s2093_s20 + $0x8] sm:$0xff] (%p2384_p13)   ;;  %v1136_v62 = vld [vmem:[%s2093_s20 + $0x10] sm:$0xff] (%p2384_p13)  }
 0x479   : > { %1106 = sbr.rel (!%p2384_p13) target bundleno = 1156 (0x484), region = 142  ;;  %v1140_v63 = vld [vmem:[%s2093_s20 + $0x18] sm:$0xff] (%p2384_p13)   ;;  %s2386_s7 = sld [smem:[#allocation23_spill]] (%p2384_p13) }
 0x47e   : > { %s1433_s23 = sshll.u32 %s2385_s25, 1 }
 0x47f   : > { %s1109_s19 = sadd.s32 %s1434_s8, %s1433_s23 }
 0x480   : > { %s1435_s4 = sshll.u32 %s1109_s19, 2 }
 0x481   : > { %s1111_s3 = scalar_lea.vmem %s2386_s7, %s1435_s4 }
 0x482   : > { %1129 = vst [vmem:[%s1111_s3] sm:$0xff] %v1128_v60   ;;  %1133 = vst [vmem:[%s1111_s3 + $0x10] sm:$0xff] %v1132_v61  }
 0x483   : > { %1137 = vst [vmem:[%s1111_s3 + $0x20] sm:$0xff] %v1136_v62   ;;  %1141 = vst [vmem:[%s1111_s3 + $0x30] sm:$0xff] %v1140_v63  }
 0x484 PF: > { %s25_s15 = sadd.s32 1, %s1811_s15   ;;  %s2387_s20 = sld [smem:[#allocation14_spill]] }
 0x485   : > { %p22_p3 = scmp.ge.s32.totalorder %s25_s15, 6   ;;  %s2388_s18 = sld [smem:[#allocation16_spill]] }
 0x486   : > { %s2389_s27 = smov %s1775_s28  ;;  %s2390_s28 = smov %s1779_s29 }
 0x487   : > { %s2391_s29 = smov %s2010_s30  ;;  %s2392_s30 = smov %s1787_s9 }
 0x488   : > { %s2393_s9 = smov %s1791_s10  ;;  %s2394_s10 = smov %s1987_s11 }
 0x489   : > { %s2395_s11 = smov %s1803_s13  ;;  %s2396_s12 = smov %s1807_s14 }
 0x48a   : > { %s2397_s13 = smov %s2387_s20  ;;  %24 = sbr.rel (!%p22_p3) target bundleno = 17 (0x11), region = 260 }
 0x48b   : > { %s2398_s14 = smov %s2388_s18 }
 0x48f   :  { %1207 = vsyncpa [#allocation3], 1 }
 0x490   :  { %1209 = vsyncpa [#allocation3 + $0x1], 1 }
 0x491   :  { %1210 = vsyncpa [#allocation5], 1 }
 0x492   :  { %1212 = vsyncpa [#allocation5 + $0x1], 1 }

</bundles_post_ra>
